<compile_context>
chip_gen: v7x
topology: tpu7x:2x2x1
jax: 0.10.0
libtpu: 0.0.40
codegen_flags: <defaults>
</compile_context>

<pallas_src>
import functools

import jax
import jax.numpy as jnp
from jax import lax
from jax.experimental import pallas as pl
from jax.experimental.pallas import tpu as pltpu

Z_DIM = 32
N_BARS = 4
HIDDEN = 1024
EPS = 1e-5


def _lane_group_sum(v, n_groups, group):
    """v: (1, n_groups*group). Returns (1, n_groups*group) where every lane holds the sum
    over the n_groups lanes congruent to it modulo `group` (stride = group). Uses
    log2(n_groups) XLU roll-folds when n_groups is a power of two (free VLIW slot)."""
    if n_groups == 1:
        return v
    if (n_groups & (n_groups - 1)) == 0:
        shift = group * (n_groups // 2)
        while shift >= group:
            v = v + pltpu.roll(v, shift=shift, axis=1)
            shift //= 2
        return v
    # fallback for non-power-of-two n_groups: explicit slice-sum + lane tile
    parts = [v[:, g * group:(g + 1) * group] for g in range(n_groups)]
    s = parts[0]
    for part in parts[1:]:
        s = s + part
    return jnp.concatenate([s] * n_groups, axis=1)


def _temporal_kernel(x_ref, w1_ref, w2_ref, out_ref, *, hidden, n_bars, z_dim):
    # x_ref  : (B, z_dim)                f32   (cast to bf16 in-kernel)
    # w1_ref : (z_dim, 2*hidden)         bf16  (KH=2 slices of W1 concatenated along Cout)
    # w2_ref : (2*hidden, n_bars*z_dim)  bf16  (block-banded ConvTranspose layout)
    # out_ref: (B, n_bars*z_dim)         f32   (bars concatenated along the lane axis)
    B = x_ref.shape[0]

    # ---- layer 1: one fused MXU matmul, bf16 inputs, f32 accumulation ----------------
    x = x_ref[...].astype(jnp.bfloat16)
    h1 = jnp.dot(x, w1_ref[...], preferred_element_type=jnp.float32)          # (B, 2H)

    # BatchNorm2d(1024) training mode (gamma=1, beta=0): stats over batch AND the 2
    # kernel-row positions. Single-pass sums, var clamped against f32 cancellation.
    cnt1 = 2.0 * B
    cs1 = jnp.sum(h1, axis=0, keepdims=True)                                  # (1, 2H)
    cq1 = jnp.sum(h1 * h1, axis=0, keepdims=True)                             # (1, 2H)
    s1 = cs1[:, :hidden] + cs1[:, hidden:]
    q1 = cq1[:, :hidden] + cq1[:, hidden:]
    mu1 = s1 / cnt1
    var1 = jnp.maximum(q1 / cnt1 - mu1 * mu1, 0.0)
    inv1 = lax.rsqrt(var1 + EPS)
    mu1t = jnp.concatenate([mu1, mu1], axis=1)                                # (1, 2H)
    inv1t = jnp.concatenate([inv1, inv1], axis=1)
    # normalize + ReLU in place in the (B, 2H) lane layout (no sublane repack)
    h1n = jnp.maximum((h1 - mu1t) * inv1t, 0.0).astype(jnp.bfloat16)          # (B, 2H)

    # ---- layer 2: single banded MXU matmul -> bars bar-major on the lane axis --------
    p = jnp.dot(h1n, w2_ref[...], preferred_element_type=jnp.float32)     # (B, n_bars*z)

    # BatchNorm2d(z_dim) training mode: channel c lives at lanes {c, c+z, c+2z, ...};
    # roll-folds broadcast each channel's group sum to every lane of that channel.
    cnt2 = float(n_bars * B)
    cs2 = jnp.sum(p, axis=0, keepdims=True)                                   # (1, n*z)
    cq2 = jnp.sum(p * p, axis=0, keepdims=True)
    s2 = _lane_group_sum(cs2, n_bars, z_dim)
    q2 = _lane_group_sum(cq2, n_bars, z_dim)
    mu2 = s2 / cnt2
    var2 = jnp.maximum(q2 / cnt2 - mu2 * mu2, 0.0)
    inv2 = lax.rsqrt(var2 + EPS)

    # Lane-dense (B, n_bars*z_dim) store.
    out_ref[...] = jnp.maximum((p - mu2) * inv2, 0.0)


def prepare_params(w1_pt, w2_pt):
    """One-time packing of the PyTorch ConvTranspose2d weights into the kernel's fused
    bf16 layout (conv biases are dropped: they cancel exactly through training-mode BN).

    w1_pt: (z_dim, hidden, 2, 1)            (Cin, Cout, KH, KW)
    w2_pt: (hidden, z_dim, n_bars-1, 1)
    """
    z_dim, hidden, kh1, _ = w1_pt.shape
    kh2 = w2_pt.shape[2]
    n_bars = kh2 + 1

    # layer 1: concatenate KH kernel slices along Cout -> (z_dim, kh1*hidden)
    w1cat = jnp.concatenate([w1_pt[:, :, k, 0] for k in range(kh1)],
                            axis=1).astype(jnp.bfloat16)

    # layer 2: block-banded ConvTranspose matrix (kh1*hidden, n_bars*z_dim):
    #   out[:, h*z:(h+1)*z] = sum_{ih} h1_row[ih] @ W2[:, :, h-ih, 0]   (0 <= h-ih < kh2)
    blocks = []
    for ih in range(kh1):
        row = []
        for h in range(n_bars):
            k = h - ih
            if 0 <= k < kh2:
                row.append(w2_pt[:, :, k, 0])
            else:
                row.append(jnp.zeros((hidden, z_dim), w2_pt.dtype))
        blocks.append(jnp.concatenate(row, axis=1))                 # (hidden, n_bars*z)
    w2band = jnp.concatenate(blocks, axis=0).astype(jnp.bfloat16)   # (kh1*hidden, n*z)

    return w1cat, w2band


@functools.partial(jax.jit, static_argnames=("z_dim", "n_bars"))
def temporal_forward(x, w1cat, w2band, *, z_dim=Z_DIM, n_bars=N_BARS):
    """x: (B, 1, z_dim, 1) NCHW; weights from prepare_params. Returns (B, z_dim, n_bars, 1).

    Supports arbitrary batch B in a single call (batch the MuseGAN (sample, track)
    invocations here — that is the dominant perf lever). BN statistics span the whole
    batch, so the batch is kept in one VMEM block; the footprint is ~0.7 MiB of weights
    plus ~16 KiB per batch row, well under scoped VMEM for batches of O(1000)."""
    w1cat, w2band = jnp.asarray(w1cat), jnp.asarray(w2band)
    B = x.shape[0]
    hidden = w1cat.shape[1] // 2

    # permute(0,2,1,3) on a (B,1,z,1) tensor + 1x1 spatial squeeze == free reshape;
    # the bf16 cast is fused into the kernel.
    x2 = x.reshape(B, z_dim)

    kernel = functools.partial(_temporal_kernel,
                               hidden=hidden, n_bars=n_bars, z_dim=z_dim)
    out_flat = pl.pallas_call(
        kernel,
        out_shape=jax.ShapeDtypeStruct((B, n_bars * z_dim), jnp.float32),
        in_specs=[pl.BlockSpec(memory_space=pltpu.MemorySpace.VMEM)] * 3,
        out_specs=pl.BlockSpec(memory_space=pltpu.MemorySpace.VMEM),
    )(x2, w1cat, w2band)

    # bar-major lane-dense (B, n_bars*z_dim) -> NCHW (B, z_dim, n_bars, 1).
    # (Downstream MuseGAN code could consume the lane-dense layout directly and skip this.)
    return jnp.transpose(out_flat.reshape(B, n_bars, z_dim), (0, 2, 1))[..., None]


# ------------------------- pure-JAX reference (for verification) -------------------------
def _bf16(v):
    # Emulate the kernel's bf16 MXU inputs; the rest of the reference stays in f32.
    return v.astype(jnp.bfloat16).astype(jnp.float32)


def _batchnorm_relu(x, eps=EPS):
    mu = jnp.mean(x, axis=(0, 2, 3), keepdims=True)
    var = jnp.mean((x - mu) ** 2, axis=(0, 2, 3), keepdims=True)
    return jnp.maximum((x - mu) * lax.rsqrt(var + eps), 0.0)


def _conv_transpose_ref(x, w_pt, b):
    # PyTorch ConvTranspose2d (stride 1, pad 0) == conv with flipped, in/out-swapped kernel
    kh, kw = w_pt.shape[2], w_pt.shape[3]
    w_conv = jnp.flip(jnp.transpose(w_pt, (1, 0, 2, 3)), axis=(2, 3))   # (Cout, Cin, KH, KW)
    y = lax.conv_general_dilated(
        x, w_conv, window_strides=(1, 1),
        padding=[(kh - 1, kh - 1), (kw - 1, kw - 1)],
        dimension_numbers=("NCHW", "OIHW", "NCHW"),
        precision=lax.Precision.HIGHEST)
    return y + b[None, :, None, None]


def temporal_ref(x, w1, b1, w2, b2):
    # NOTE: the reference keeps the conv biases; the kernel drops them (they cancel
    # through training-mode BN), and the test below verifies that algebra.
    x = jnp.transpose(x, (0, 2, 1, 3))
    y = _batchnorm_relu(_conv_transpose_ref(_bf16(x), _bf16(w1), b1))
    y = _batchnorm_relu(_conv_transpose_ref(_bf16(y), _bf16(w2), b2))
    return y


if __name__ == "__main__":
    key = jax.random.PRNGKey(0)
    kx, k1, k2, kb1, kb2 = jax.random.split(key, 5)

    # Deterministic kaiming_normal_-style init: std = sqrt(2 / fan_in),
    # fan_in = weight.size(1) * prod(kernel) (PyTorch convention for ConvTranspose2d).
    fan1 = HIDDEN * 2 * 1
    w1 = jax.random.normal(k1, (Z_DIM, HIDDEN, 2, 1), jnp.float32) * jnp.sqrt(2.0 / fan1)
    fan2 = Z_DIM * (N_BARS - 1) * 1
    w2 = jax.random.normal(k2, (HIDDEN, Z_DIM, N_BARS - 1, 1), jnp.float32) * jnp.sqrt(2.0 / fan2)
    b1 = 0.01 * jax.random.normal(kb1, (HIDDEN,), jnp.float32)
    b2 = 0.01 * jax.random.normal(kb2, (Z_DIM,), jnp.float32)

    w1cat, w2band = prepare_params(w1, w2)       # one-time packing (bf16, fused/banded)

    # small demo batch (matches the module's typical per-call shape)
    B = 2
    x = jax.random.normal(kx, (B, 1, Z_DIM, 1), jnp.float32)
    out = jax.block_until_ready(temporal_forward(x, w1cat, w2band))
    ref = jax.block_until_ready(temporal_ref(x, w1, b1, w2, b2))
    assert out.shape == (B, Z_DIM, N_BARS, 1), out.shape
    max_err = float(jnp.max(jnp.abs(out - ref)))
    assert max_err < 2e-2, max_err

    # batched-caller path (the main perf lever): same kernel, one call, larger B
    Bb = 16
    xb = jax.random.normal(jax.random.PRNGKey(1), (Bb, 1, Z_DIM, 1), jnp.float32)
    outb = jax.block_until_ready(temporal_forward(xb, w1cat, w2band))
    refb = jax.block_until_ready(temporal_ref(xb, w1, b1, w2, b2))
    assert outb.shape == (Bb, Z_DIM, N_BARS, 1), outb.shape
    max_err_b = float(jnp.max(jnp.abs(outb - refb)))
    assert max_err_b < 2e-2, max_err_b

    print("KERNEL_OK")
</pallas_src>

<mosaic_0001>
module attributes {stable_mosaic.version = 11 : i64} {
  func.func @_temporal_kernel(%arg0: memref<2x32xf32, #tpu.memory_space<vmem>>, %arg1: memref<32x2048xbf16, #tpu.memory_space<vmem>>, %arg2: memref<2048x128xbf16, #tpu.memory_space<vmem>>, %arg3: memref<2x128xf32, #tpu.memory_space<vmem>>) attributes {dimension_semantics = [], scalar_prefetch = 0 : i64, scratch_operands = 0 : i64, tpu.core_type = #tpu.core_type<tc>} {
    %c0 = arith.constant 0 : index
    %c0_0 = arith.constant 0 : index
    %0 = vector.load %arg0[%c0, %c0_0] : memref<2x32xf32, #tpu.memory_space<vmem>>, vector<2x32xf32>
    %1 = arith.truncf %0 : vector<2x32xf32> to vector<2x32xbf16>
    %c0_1 = arith.constant 0 : index
    %c0_2 = arith.constant 0 : index
    %2 = vector.load %arg1[%c0_1, %c0_2] : memref<32x2048xbf16, #tpu.memory_space<vmem>>, vector<32x2048xbf16>
    %cst = arith.constant dense<0.000000e+00> : vector<2x2048xf32>
    %3 = tpu.matmul %1, %2, %cst {dimension_numbers = #tpu.dot_dimension_numbers<[1], [0], [0], [1], [0, 0, 1, 1], [], []>} : vector<2x32xbf16>, vector<32x2048xbf16>, vector<2x2048xf32> -> vector<2x2048xf32>
    %cst_3 = arith.constant dense<0.000000e+00> : vector<2048xf32>
    %4 = vector.multi_reduction <add>, %3, %cst_3 [0] : vector<2x2048xf32> to vector<2048xf32>
    %5 = vector.shape_cast %4 : vector<2048xf32> to vector<1x2048xf32>
    %6 = arith.mulf %3, %3 : vector<2x2048xf32>
    %cst_4 = arith.constant dense<0.000000e+00> : vector<2048xf32>
    %7 = vector.multi_reduction <add>, %6, %cst_4 [0] : vector<2x2048xf32> to vector<2048xf32>
    %8 = vector.shape_cast %7 : vector<2048xf32> to vector<1x2048xf32>
    %9 = vector.extract_strided_slice %5 {offsets = [0, 0], sizes = [1, 1024], strides = [1, 1]} : vector<1x2048xf32> to vector<1x1024xf32>
    %10 = vector.extract_strided_slice %5 {offsets = [0, 1024], sizes = [1, 1024], strides = [1, 1]} : vector<1x2048xf32> to vector<1x1024xf32>
    %11 = arith.addf %9, %10 : vector<1x1024xf32>
    %12 = vector.extract_strided_slice %8 {offsets = [0, 0], sizes = [1, 1024], strides = [1, 1]} : vector<1x2048xf32> to vector<1x1024xf32>
    %13 = vector.extract_strided_slice %8 {offsets = [0, 1024], sizes = [1, 1024], strides = [1, 1]} : vector<1x2048xf32> to vector<1x1024xf32>
    %14 = arith.addf %12, %13 : vector<1x1024xf32>
    %cst_5 = arith.constant 4.000000e+00 : f32
    %15 = vector.broadcast %cst_5 : f32 to vector<1x1024xf32>
    %16 = arith.divf %11, %15 : vector<1x1024xf32>
    %cst_6 = arith.constant 4.000000e+00 : f32
    %17 = vector.broadcast %cst_6 : f32 to vector<1x1024xf32>
    %18 = arith.divf %14, %17 : vector<1x1024xf32>
    %19 = arith.mulf %16, %16 : vector<1x1024xf32>
    %20 = arith.subf %18, %19 : vector<1x1024xf32>
    %cst_7 = arith.constant 0.000000e+00 : f32
    %21 = vector.broadcast %cst_7 : f32 to vector<1x1024xf32>
    %22 = arith.maximumf %20, %21 : vector<1x1024xf32>
    %cst_8 = arith.constant 9.99999974E-6 : f32
    %23 = vector.broadcast %cst_8 : f32 to vector<1x1024xf32>
    %24 = arith.addf %22, %23 : vector<1x1024xf32>
    %25 = math.rsqrt %24 : vector<1x1024xf32>
    %26 = tpu.concatenate %16, %16 in 1 : vector<1x1024xf32>, vector<1x1024xf32> -> vector<1x2048xf32>
    %27 = tpu.concatenate %25, %25 in 1 : vector<1x1024xf32>, vector<1x1024xf32> -> vector<1x2048xf32>
    %28 = vector.broadcast %26 : vector<1x2048xf32> to vector<2x2048xf32>
    %29 = arith.subf %3, %28 : vector<2x2048xf32>
    %30 = vector.broadcast %27 : vector<1x2048xf32> to vector<2x2048xf32>
    %31 = arith.mulf %29, %30 : vector<2x2048xf32>
    %cst_9 = arith.constant 0.000000e+00 : f32
    %32 = vector.broadcast %cst_9 : f32 to vector<2x2048xf32>
    %33 = arith.maximumf %31, %32 : vector<2x2048xf32>
    %34 = arith.truncf %33 : vector<2x2048xf32> to vector<2x2048xbf16>
    %c0_10 = arith.constant 0 : index
    %c0_11 = arith.constant 0 : index
    %35 = vector.load %arg2[%c0_10, %c0_11] : memref<2048x128xbf16, #tpu.memory_space<vmem>>, vector<2048x128xbf16>
    %cst_12 = arith.constant dense<0.000000e+00> : vector<2x128xf32>
    %36 = tpu.matmul %34, %35, %cst_12 {dimension_numbers = #tpu.dot_dimension_numbers<[1], [0], [0], [1], [0, 0, 1, 1], [], []>} : vector<2x2048xbf16>, vector<2048x128xbf16>, vector<2x128xf32> -> vector<2x128xf32>
    %cst_13 = arith.constant dense<0.000000e+00> : vector<128xf32>
    %37 = vector.multi_reduction <add>, %36, %cst_13 [0] : vector<2x128xf32> to vector<128xf32>
    %38 = vector.shape_cast %37 : vector<128xf32> to vector<1x128xf32>
    %39 = arith.mulf %36, %36 : vector<2x128xf32>
    %cst_14 = arith.constant dense<0.000000e+00> : vector<128xf32>
    %40 = vector.multi_reduction <add>, %39, %cst_14 [0] : vector<2x128xf32> to vector<128xf32>
    %41 = vector.shape_cast %40 : vector<128xf32> to vector<1x128xf32>
    %c64_i32 = arith.constant 64 : i32
    %42 = tpu.dynamic_rotate %38 by %c64_i32 dim 1 : vector<1x128xf32>, i32 -> vector<1x128xf32>
    %43 = arith.addf %38, %42 : vector<1x128xf32>
    %c32_i32 = arith.constant 32 : i32
    %44 = tpu.dynamic_rotate %43 by %c32_i32 dim 1 : vector<1x128xf32>, i32 -> vector<1x128xf32>
    %45 = arith.addf %43, %44 : vector<1x128xf32>
    %c64_i32_15 = arith.constant 64 : i32
    %46 = tpu.dynamic_rotate %41 by %c64_i32_15 dim 1 : vector<1x128xf32>, i32 -> vector<1x128xf32>
    %47 = arith.addf %41, %46 : vector<1x128xf32>
    %c32_i32_16 = arith.constant 32 : i32
    %48 = tpu.dynamic_rotate %47 by %c32_i32_16 dim 1 : vector<1x128xf32>, i32 -> vector<1x128xf32>
    %49 = arith.addf %47, %48 : vector<1x128xf32>
    %cst_17 = arith.constant 8.000000e+00 : f32
    %50 = vector.broadcast %cst_17 : f32 to vector<1x128xf32>
    %51 = arith.divf %45, %50 : vector<1x128xf32>
    %cst_18 = arith.constant 8.000000e+00 : f32
    %52 = vector.broadcast %cst_18 : f32 to vector<1x128xf32>
    %53 = arith.divf %49, %52 : vector<1x128xf32>
    %54 = arith.mulf %51, %51 : vector<1x128xf32>
    %55 = arith.subf %53, %54 : vector<1x128xf32>
    %cst_19 = arith.constant 0.000000e+00 : f32
    %56 = vector.broadcast %cst_19 : f32 to vector<1x128xf32>
    %57 = arith.maximumf %55, %56 : vector<1x128xf32>
    %cst_20 = arith.constant 9.99999974E-6 : f32
    %58 = vector.broadcast %cst_20 : f32 to vector<1x128xf32>
    %59 = arith.addf %57, %58 : vector<1x128xf32>
    %60 = math.rsqrt %59 : vector<1x128xf32>
    %61 = vector.broadcast %51 : vector<1x128xf32> to vector<2x128xf32>
    %62 = arith.subf %36, %61 : vector<2x128xf32>
    %63 = vector.broadcast %60 : vector<1x128xf32> to vector<2x128xf32>
    %64 = arith.mulf %62, %63 : vector<2x128xf32>
    %cst_21 = arith.constant 0.000000e+00 : f32
    %65 = vector.broadcast %cst_21 : f32 to vector<2x128xf32>
    %66 = arith.maximumf %64, %65 : vector<2x128xf32>
    %c0_22 = arith.constant 0 : index
    %c0_23 = arith.constant 0 : index
    %67 = vector.load %arg3[%c0_22, %c0_23] : memref<2x128xf32, #tpu.memory_space<vmem>>, vector<2x128xf32>
    tpu.vector_store %arg3[%c0_22, %c0_23], %66 {strides = array<i32>} : memref<2x128xf32, #tpu.memory_space<vmem>>, vector<2x128xf32>,
    return
  }
}

</mosaic_0001>

<bundles_post_ra>
// kernel: temporal_forward.1
= control target key start
LH: loop header
LB: loop body
LE: loop exit
PB: predicated region body
PF: predicated region fallthrough
CT: control target
= control target key end

     0   :  { %8 = vsyncpa [#allocation3], 0  ;;  %s3378_s0 = inlined_call_operand.vmem [shape: f32[2,32], index: 0, kind: input, shape index: {}]   ;;  %s3379_s1 = inlined_call_operand.hbm [shape: bf16[32,2048], index: 1, kind: input, shape index: {}]   ;;  %s3380_s2 = inlined_call_operand.hbm [shape: bf16[2048,128], index: 2, kind: input, shape index: {}]   ;;  %s3381_s3 = inlined_call_operand.vmem [shape: f32[2,128], index: 3, kind: output, shape index: {}]  }
   0x1   :  { %9 = vsyncpa [#allocation5], 0  ;;  %s2953_s12 = smov [#allocation2]   ;;  %s2905_s16 = scalar_lea.hbm %s3379_s1, 4096 }
   0x2   :  { %s17_s13 = sshll.u32 %s2953_s12, 4  ;;  %p2906_p0 = scmp.ne.s32.totalorder %s3379_s1, %s2905_s16  ;;  %s18_s13 = int_to_ptr.vmem [resolvable:$true] %s17_s13 }
   0x3   :  { %p2909_p1 = scmp.lt.u32.totalorder %s2905_s16, %s3379_s1 }
   0x5   :  { %p2911_p2 = pnand %p2909_p1, %p2906_p0 }
   0x7   :  { %2914 = shalt.err (!%p2911_p2)
}
   0x8   :  { %s2915_s21 = scalar_lea.vmem %s18_s13, 4096  ;;  %p2920_p4 = scmp.lt.s32.totalorder %s18_s13, %s18_s13 }
   0x9   :  { %p2916_p3 = scmp.ne.s32.totalorder %s18_s13, %s2915_s21  ;;  %p2921_p5 = scmp.lt.s32.totalorder %s2915_s21, %s2915_s21 }
   0xb   :  { %p2922_p6 = por %p2921_p5, %p2920_p4 }
   0xd   :  { %p2923_p7 = pnand %p2922_p6, %p2916_p3 }
   0xf   :  { %2926 = shalt.err (!%p2923_p7)
}
  0x10   :  { %s2954_s22 = smov 1024   ;;  %s2955_s23 = smov 64  }
  0x11   :  { %23 = dma.hbm_to_vmem [thread:$0]  %s3379_s1, 4096, %s18_s13, [#allocation3], %s2954_s22, %s2954_s22, %s2955_s23  }
  0x12   :  { %s2956_s26 = smov [#allocation4]   ;;  %s2927_s30 = scalar_lea.hbm %s3380_s2, 16384 }
  0x13   :  { %s29_s27 = sshll.u32 %s2956_s26, 4  ;;  %p2928_p8 = scmp.ne.s32.totalorder %s3380_s2, %s2927_s30  ;;  %s30_s27 = int_to_ptr.vmem [resolvable:$true] %s29_s27 }
  0x14   :  { %p2931_p9 = scmp.lt.u32.totalorder %s2927_s30, %s3380_s2 }
  0x16   :  { %p2933_p10 = pnand %p2931_p9, %p2928_p8 }
  0x18   :  { %2936 = shalt.err (!%p2933_p10)
}
  0x19   :  { %s2937_s8 = scalar_lea.vmem %s30_s27, 16384  ;;  %p2942_p12 = scmp.lt.s32.totalorder %s30_s27, %s30_s27 }
  0x1a   :  { %p2938_p11 = scmp.ne.s32.totalorder %s30_s27, %s2937_s8  ;;  %p2943_p13 = scmp.lt.s32.totalorder %s2937_s8, %s2937_s8 }
  0x1c   :  { %p2944_p0 = por %p2943_p13, %p2942_p12 }
  0x1e   :  { %p2945_p1 = pnand %p2944_p0, %p2938_p11 }
  0x20   :  { %2948 = shalt.err (!%p2945_p1)
}
  0x21   :  { %s2957_s1 = smov 4  }
  0x22   :  { %35 = dma.hbm_to_vmem [thread:$0]  %s3380_s2, 16384, %s30_s27, [#allocation5], %s2955_s23, %s2955_s23, %s2957_s1  }
  0x23   :  { %2949 = dma.done.wait [#allocation3], 4096  }
  0x24   :  { %2950 = vsyncadd [#allocation3], 4294963200 }
  0x25   :  { %2951 = dma.done.wait [#allocation5], 16384  }
  0x26   :  { %2952 = vsyncadd [#allocation5], 4294950912  ;;  %v2958_v0 = vmov 0   ;;  %v45_v1 = vld [vmem:[#allocation2] sm:$0xff]  ;;  %v46_v3 = vld [vmem:[#allocation2 + $0x8] sm:$0xff]  ;;  %vm237_vm0 = vcmask 261120  }
  0x27   :  { %273 = vmatprep.mubr.bf16.mxu0 %v2958_v0  ;;  %314 = vmatprep.mubr.bf16.mxu1 %v2958_v0  ;;  %v53_v2 = vld [vmem:[#allocation2 + $0x40] sm:$0xff]  ;;  %v54_v5 = vld [vmem:[#allocation2 + $0x48] sm:$0xff]  ;;  %v47_v15 = vld [vmem:[#allocation2 + $0x10] sm:$0xff]  ;;  %vm569_vm1 = vcmask 1041408  }
  0x28   :  { %v2409_v4 = vcombine.high %v45_v1, %v53_v2  ;;  %v2408_v6 = vcombine.low %v45_v1, %v53_v2  ;;  %v61_v7 = vld [vmem:[#allocation2 + $0x80] sm:$0xff]  ;;  %v2411_v9 = vcombine.high %v46_v3, %v54_v5  ;;  %v2410_v10 = vcombine.low %v46_v3, %v54_v5  ;;  %v62_v12 = vld [vmem:[#allocation2 + $0x88] sm:$0xff]  ;;  %v55_v16 = vld [vmem:[#allocation2 + $0x50] sm:$0xff] }
  0x29   :  { %v69_v8 = vld [vmem:[#allocation2 + $0xc0] sm:$0xff]  ;;  %v70_v13 = vld [vmem:[#allocation2 + $0xc8] sm:$0xff]  ;;  %v48_v17 = vld [vmem:[#allocation2 + $0x18] sm:$0xff]  ;;  %v2413_v22 = vcombine.high %v47_v15, %v55_v16  ;;  %v2412_v29 = vcombine.low %v47_v15, %v55_v16 }
  0x2a   :  { %v2425_v11 = vcombine.high %v61_v7, %v69_v8  ;;  %241 = vmatprep.subr.bf16.mxu0 %v2409_v4  ;;  %v2427_v14 = vcombine.high %v62_v12, %v70_v13  ;;  %282 = vmatprep.subr.bf16.mxu1 %v2411_v9  ;;  %v2424_v18 = vcombine.low %v61_v7, %v69_v8  ;;  %v43_v19 = vld [vmem:[%s3378_s0] sm:$0x3]  ;;  %v56_v20 = vld [vmem:[#allocation2 + $0x58] sm:$0xff]  ;;  %v63_v24 = vld [vmem:[#allocation2 + $0x90] sm:$0xff]  ;;  %s2959_s0 = smov 32  }
  0x2b   :  { %242 = vmatpush1.bf16.msra.mxu0 %v2408_v6  ;;  %283 = vmatpush1.bf16.msra.mxu1 %v2410_v10  ;;  %v2426_v21 = vcombine.low %v62_v12, %v70_v13  ;;  %v2415_v23 = vcombine.high %v48_v17, %v56_v20  ;;  %v71_v25 = vld [vmem:[#allocation2 + $0xd0] sm:$0xff]  ;;  %v3012_v26 = vpack.c.bf16 %v43_v19, %v43_v19  ;;  %v64_v27 = vld [vmem:[#allocation2 + $0x98] sm:$0xff]  ;;  %v49_v32 = vld [vmem:[#allocation2 + $0x20] sm:$0xff] }
  0x2c   :  { %243 = vmatprep.subr.bf16.mxu0 %v2425_v11  ;;  %284 = vmatprep.subr.bf16.mxu1 %v2427_v14  ;;  %v72_v28 = vld [vmem:[#allocation2 + $0xd8] sm:$0xff]  ;;  %v2414_v30 = vcombine.low %v48_v17, %v56_v20  ;;  %v2429_v31 = vcombine.high %v63_v24, %v71_v25  ;;  %v57_v34 = vld [vmem:[#allocation2 + $0x60] sm:$0xff]  ;;  %v50_v35 = vld [vmem:[#allocation2 + $0x28] sm:$0xff]  ;;  %v2428_v37 = vcombine.low %v63_v24, %v71_v25 }
  0x2d   :  { %v2431_v33 = vcombine.high %v64_v27, %v72_v28  ;;  %v58_v36 = vld [vmem:[#allocation2 + $0x68] sm:$0xff]  ;;  %v65_v38 = vld [vmem:[#allocation2 + $0xa0] sm:$0xff]  ;;  %v2430_v40 = vcombine.low %v64_v27, %v72_v28  ;;  %v2417_v41 = vcombine.high %v49_v32, %v57_v34  ;;  %v2416_v45 = vcombine.low %v49_v32, %v57_v34  ;;  %v51_v46 = vld [vmem:[#allocation2 + $0x30] sm:$0xff] }
  0x2e   :  { %v73_v39 = vld [vmem:[#allocation2 + $0xe0] sm:$0xff]  ;;  %v66_v42 = vld [vmem:[#allocation2 + $0xa8] sm:$0xff]  ;;  %v2419_v44 = vcombine.high %v50_v35, %v58_v36  ;;  %v59_v47 = vld [vmem:[#allocation2 + $0x70] sm:$0xff]  ;;  %v2418_v48 = vcombine.low %v50_v35, %v58_v36 }
  0x2f   :  { %244 = vmatpush1.bf16.msra.mxu0 %v2424_v18  ;;  %285 = vmatpush1.bf16.msra.mxu1 %v2426_v21  ;;  %v74_v43 = vld [vmem:[#allocation2 + $0xe8] sm:$0xff]  ;;  %v2433_v49 = vcombine.high %v65_v38, %v73_v39  ;;  %v52_v50 = vld [vmem:[#allocation2 + $0x38] sm:$0xff]  ;;  %v2432_v53 = vcombine.low %v65_v38, %v73_v39  ;;  %v67_v54 = vld [vmem:[#allocation2 + $0xb0] sm:$0xff]  ;;  %v2421_v57 = vcombine.high %v51_v46, %v59_v47 }
  0x30   :  { %323 = vmatprep.subr.bf16.mxu0 %v2413_v22  ;;  %364 = vmatprep.subr.bf16.mxu1 %v2415_v23  ;;  %v60_v51 = vld [vmem:[#allocation2 + $0x78] sm:$0xff]  ;;  %v2435_v52 = vcombine.high %v66_v42, %v74_v43  ;;  %v75_v55 = vld [vmem:[#allocation2 + $0xf0] sm:$0xff]  ;;  %v2434_v56 = vcombine.low %v66_v42, %v74_v43  ;;  %v2420_v61 = vcombine.low %v51_v46, %v59_v47  ;;  %v2759_v4 = vld [vmem:[#allocation4 + $0x40] sm:$0xff]  }
  0x31   :  { %v68_v58 = vld [vmem:[#allocation2 + $0xb8] sm:$0xff]  ;;  %v2423_v60 = vcombine.high %v52_v50, %v60_v51  ;;  %v2422_v62 = vcombine.low %v52_v50, %v60_v51  ;;  %v2437_v63 = vcombine.high %v67_v54, %v75_v55  ;;  %v2436_v2 = vcombine.low %v67_v54, %v75_v55  ;;  %v2760_v5 = vld [vmem:[#allocation4 + $0xc0] sm:$0xff]   ;;  %v2763_v8 = vld [vmem:[#allocation4 + $0x48] sm:$0xff]  }
  0x32   :  { %2440 = vmatmul.mubr.msk.bf16.vlgmr.msra.gmra.mrb[0].mxu0 %vm237_vm0, %v3012_v26  ;;  %2441 = vmatmul.mubr.msk.bf16.vlgmr.msra.gmra.mrb[0].mxu1 %vm237_vm0, %v3012_v26  ;;  %v76_v59 = vld [vmem:[#allocation2 + $0xf8] sm:$0xff]  ;;  %v2761_v6 = vld [vmem:[#allocation4] sm:$0xff]   ;;  %v2764_v9 = vld [vmem:[#allocation4 + $0xc8] sm:$0xff]  }
  0x33   :  { %324 = vmatpush1.bf16.msra.mxu0 %v2412_v29  ;;  %365 = vmatpush1.bf16.msra.mxu1 %v2414_v30  ;;  %v2439_v1 = vcombine.high %v68_v58, %v76_v59  ;;  %v2438_v3 = vcombine.low %v68_v58, %v76_v59  ;;  %v2762_v7 = vld [vmem:[#allocation4 + $0x80] sm:$0xff]   ;;  %v2765_v10 = vld [vmem:[#allocation4 + $0x8] sm:$0xff]   ;;  %v2767_v11 = vld [vmem:[#allocation4 + $0x50] sm:$0xff]  }
  0x34   :  { %325 = vmatprep.subr.bf16.mxu0 %v2429_v31  ;;  %366 = vmatprep.subr.bf16.mxu1 %v2431_v33  ;;  %v2768_v12 = vld [vmem:[#allocation4 + $0xd0] sm:$0xff]   ;;  %v2771_v15 = vld [vmem:[#allocation4 + $0x58] sm:$0xff]   ;;  %v2775_v19 = vld [vmem:[#allocation4 + $0x60] sm:$0xff]  }
  0x35   :  { %355 = vmatprep.mubr.bf16.mxu0 %v2958_v0  ;;  %396 = vmatprep.mubr.bf16.mxu1 %v2958_v0  ;;  %v2769_v13 = vld [vmem:[#allocation4 + $0x10] sm:$0xff]   ;;  %v2772_v16 = vld [vmem:[#allocation4 + $0xd8] sm:$0xff]   ;;  %v2776_v20 = vld [vmem:[#allocation4 + $0xe0] sm:$0xff]  }
  0x36   :  { %v2770_v14 = vld [vmem:[#allocation4 + $0x90] sm:$0xff]   ;;  %v2773_v17 = vld [vmem:[#allocation4 + $0x18] sm:$0xff]   ;;  %v2777_v21 = vld [vmem:[#allocation4 + $0x20] sm:$0xff]  }
  0x37   :  { %326 = vmatpush1.bf16.msra.mxu0 %v2428_v37  ;;  %367 = vmatpush1.bf16.msra.mxu1 %v2430_v40  ;;  %v2774_v18 = vld [vmem:[#allocation4 + $0x98] sm:$0xff]   ;;  %v2778_v22 = vld [vmem:[#allocation4 + $0xa0] sm:$0xff]   ;;  %v2779_v23 = vld [vmem:[#allocation4 + $0x68] sm:$0xff]   ;;  %v883_v37 = vlaneseq }
  0x38   :  { %405 = vmatprep.subr.bf16.mxu0 %v2417_v41  ;;  %446 = vmatprep.subr.bf16.mxu1 %v2419_v44  ;;  %v2780_v24 = vld [vmem:[#allocation4 + $0xe8] sm:$0xff]   ;;  %v2783_v27 = vld [vmem:[#allocation4 + $0x70] sm:$0xff]   ;;  %v2787_v31 = vld [vmem:[#allocation4 + $0x78] sm:$0xff]  }
  0x39   :  { %v2781_v25 = vld [vmem:[#allocation4 + $0x28] sm:$0xff]   ;;  %v2784_v28 = vld [vmem:[#allocation4 + $0xf0] sm:$0xff]   ;;  %v2788_v32 = vld [vmem:[#allocation4 + $0xf8] sm:$0xff]   ;;  %v884_v43 = vshrl.u32 %v883_v37, 7 }
  0x3a   :  { %2442 = vmatmul.mubr.msk.bf16.vlgmr.msra.gmra.mrb[4].mxu0 %vm237_vm0, %v3012_v26  ;;  %2443 = vmatmul.mubr.msk.bf16.vlgmr.msra.gmra.mrb[4].mxu1 %vm237_vm0, %v3012_v26  ;;  %v2785_v29 = vld [vmem:[#allocation4 + $0x30] sm:$0xff]   ;;  %v2789_v33 = vld [vmem:[#allocation4 + $0x38] sm:$0xff]   ;;  %v2791_v35 = vld [vmem:[#allocation4 + $0x140] sm:$0xff]  }
  0x3b   :  { %406 = vmatpush1.bf16.msra.mxu0 %v2416_v45  ;;  %447 = vmatpush1.bf16.msra.mxu1 %v2418_v48  ;;  %v2786_v30 = vld [vmem:[#allocation4 + $0xb0] sm:$0xff]   ;;  %v2790_v34 = vld [vmem:[#allocation4 + $0xb8] sm:$0xff]   ;;  %v2792_v36 = vld [vmem:[#allocation4 + $0x1c0] sm:$0xff]  }
  0x3c   :  { %407 = vmatprep.subr.bf16.mxu0 %v2433_v49  ;;  %448 = vmatprep.subr.bf16.mxu1 %v2435_v52 }
  0x3d   :  { %437 = vmatprep.mubr.bf16.mxu0 %v2958_v0  ;;  %478 = vmatprep.mubr.bf16.mxu1 %v2958_v0 }
  0x3f   :  { %408 = vmatpush1.bf16.msra.mxu0 %v2432_v53  ;;  %449 = vmatpush1.bf16.msra.mxu1 %v2434_v56 }
  0x40   :  { %487 = vmatprep.subr.bf16.mxu0 %v2421_v57  ;;  %528 = vmatprep.subr.bf16.mxu1 %v2423_v60 }
  0x42   :  { %2444 = vmatmul.mubr.msk.bf16.vlgmr.msra.gmra.mrb[8].mxu0 %vm237_vm0, %v3012_v26  ;;  %2445 = vmatmul.mubr.msk.bf16.vlgmr.msra.gmra.mrb[8].mxu1 %vm237_vm0, %v3012_v26 }
  0x43   :  { %488 = vmatpush1.bf16.msra.mxu0 %v2420_v61  ;;  %529 = vmatpush1.bf16.msra.mxu1 %v2422_v62 }
  0x44   :  { %489 = vmatprep.subr.bf16.mxu0 %v2437_v63  ;;  %530 = vmatprep.subr.bf16.mxu1 %v2439_v1 }
  0x45   :  { %519 = vmatprep.mubr.bf16.mxu0 %v2958_v0  ;;  %560 = vmatprep.mubr.bf16.mxu1 %v2958_v0  ;;  %v2766_v0 = vld [vmem:[#allocation4 + $0x88] sm:$0xff]  }
  0x47   :  { %490 = vmatpush1.bf16.msra.mxu0 %v2436_v2  ;;  %531 = vmatpush1.bf16.msra.mxu1 %v2438_v3 }
  0x48   :  { %2576 = vmatprep.subr.bf16.mxu0 %v2759_v4  ;;  %2598 = vmatprep.subr.bf16.mxu1 %v2760_v5 }
  0x4a   :  { %2446 = vmatmul.mubr.msk.bf16.vlgmr.msra.gmra.mrb[12].mxu0 %vm237_vm0, %v3012_v26  ;;  %2447 = vmatmul.mubr.msk.bf16.vlgmr.msra.gmra.mrb[12].mxu1 %vm237_vm0, %v3012_v26  ;;  %v2782_v26 = vld [vmem:[#allocation4 + $0xa8] sm:$0xff]  }
  0x4b   :  { %2577 = vmatpush3.bf16.msra.mxu0 %v2761_v6  ;;  %2599 = vmatpush3.bf16.msra.mxu1 %v2762_v7 }
  0x4c   :  { %2578 = vmatprep.subr.bf16.mxu0 %v2763_v8  ;;  %2600 = vmatprep.subr.bf16.mxu1 %v2764_v9 }
  0x4f   :  { %2579 = vmatpush3.bf16.msra.mxu0 %v2765_v10  ;;  %2601 = vmatpush3.bf16.msra.mxu1 %v2766_v0 }
  0x50   :  { %2580 = vmatprep.subr.bf16.mxu0 %v2767_v11  ;;  %2602 = vmatprep.subr.bf16.mxu1 %v2768_v12 }
  0x53   :  { %2581 = vmatpush3.bf16.msra.mxu0 %v2769_v13  ;;  %2603 = vmatpush3.bf16.msra.mxu1 %v2770_v14 }
  0x54   :  { %2582 = vmatprep.subr.bf16.mxu0 %v2771_v15  ;;  %2604 = vmatprep.subr.bf16.mxu1 %v2772_v16 }
  0x57   :  { %2583 = vmatpush3.bf16.msra.mxu0 %v2773_v17  ;;  %2605 = vmatpush3.bf16.msra.mxu1 %v2774_v18 }
  0x58   :  { %2584 = vmatprep.subr.bf16.mxu0 %v2775_v19  ;;  %2606 = vmatprep.subr.bf16.mxu1 %v2776_v20 }
  0x5b   :  { %2585 = vmatpush3.bf16.msra.mxu0 %v2777_v21  ;;  %2607 = vmatpush3.bf16.msra.mxu1 %v2778_v22 }
  0x5c   :  { %2586 = vmatprep.subr.bf16.mxu0 %v2779_v23  ;;  %2608 = vmatprep.subr.bf16.mxu1 %v2780_v24 }
  0x5f   :  { %2587 = vmatpush3.bf16.msra.mxu0 %v2781_v25  ;;  %2609 = vmatpush3.bf16.msra.mxu1 %v2782_v26 }
  0x60   :  { %2588 = vmatprep.subr.bf16.mxu0 %v2783_v27  ;;  %2610 = vmatprep.subr.bf16.mxu1 %v2784_v28 }
  0x63   :  { %2589 = vmatpush3.bf16.msra.mxu0 %v2785_v29  ;;  %2611 = vmatpush3.bf16.msra.mxu1 %v2786_v30 }
  0x64   :  { %2590 = vmatprep.subr.bf16.mxu0 %v2787_v31  ;;  %2612 = vmatprep.subr.bf16.mxu1 %v2788_v32 }
  0x67   :  { %2591 = vmatpush3.bf16.msra.mxu0 %v2789_v33  ;;  %2613 = vmatpush3.bf16.msra.mxu1 %v2790_v34 }
  0x68   :  { %2620 = vmatprep.subr.bf16.mxu0 %v2791_v35  ;;  %2642 = vmatprep.subr.bf16.mxu1 %v2792_v36  ;;  %v3076_v36 = vsub.s32 0, %v884_v43 }
 0x105   :  { %v3036_v38 = vpop.f32.mrb[0].mxu0  ;;  %v3042_v41 = vpop.f32.mrb[0].mxu1 }
 0x106   :  { %v570_v39 = vsel %vm569_vm1, %v3036_v38, 0.0  ;;  %v682_v40 = vmul.f32 %v3036_v38, %v3036_v38  ;;  %v3044_v42 = vpop.f32.mrb[1].mxu0  ;;  %v584_v45 = vsel %vm569_vm1, %v3042_v41, 0.0  ;;  %v684_v46 = vmul.f32 %v3042_v41, %v3042_v41  ;;  %v3052_v48 = vpop.f32.mrb[1].mxu1 }
 0x107   :  { %v571_v44 = vrot.slane %v570_v39, 4  ;;  %v577_v47 = vsel %vm569_vm1, %v3044_v42, 0.0  ;;  %v279_v49 = vpop.f32.mrb[2].mxu0  ;;  %v585_v51 = vrot.slane %v584_v45, 4  ;;  %v683_v53 = vmul.f32 %v3044_v42, %v3044_v42  ;;  %v320_v54 = vpop.f32.mrb[2].mxu1 }
 0x108   :  { %v698_v50 = vsel %vm569_vm1, %v682_v40, 0.0  ;;  %v578_v52 = vrot.slane %v577_v47, 4  ;;  %v280_v55 = vpop.f32.mrb[3].mxu0  ;;  %v712_v58 = vsel %vm569_vm1, %v684_v46, 0.0  ;;  %v591_v59 = vsel %vm569_vm1, %v3052_v48, 0.0  ;;  %v321_v60 = vpop.f32.mrb[3].mxu1 }
 0x109   :  { %v572_v56 = vadd.f32 %v571_v44, %v570_v39  ;;  %v699_v57 = vrot.slane %v698_v50, 4  ;;  %v586_v61 = vadd.f32 %v585_v51, %v584_v45  ;;  %v713_v62 = vrot.slane %v712_v58, 4 }
 0x10a   :  { %v579_v63 = vadd.f32 %v578_v52, %v577_v47  ;;  %v705_v1 = vsel %vm569_vm1, %v683_v53, 0.0  ;;  %v592_v5 = vrot.slane %v591_v59, 4  ;;  %v685_v9 = vmul.f32 %v3052_v48, %v3052_v48 }
 0x10b   :  { %v573_v2 = vrot.slane %v572_v56, 2  ;;  %v700_v3 = vadd.f32 %v699_v57, %v698_v50  ;;  %v706_v4 = vrot.slane %v705_v1, 4  ;;  %v587_v6 = vrot.slane %v586_v61, 2 }
 0x10c   :  { %v714_v7 = vadd.f32 %v713_v62, %v712_v58  ;;  %v580_v8 = vrot.slane %v579_v63, 2  ;;  %v593_v12 = vadd.f32 %v592_v5, %v591_v59  ;;  %v719_v17 = vsel %vm569_vm1, %v685_v9, 0.0 }
 0x10d   :  { %v574_v10 = vadd.f32 %v573_v2, %v572_v56  ;;  %v701_v0 = vrot.slane %v700_v3, 2  ;;  %v707_v11 = vadd.f32 %v706_v4, %v705_v1  ;;  %v3063_v13 = vpop.f32.mrb[4].mxu0  ;;  %v588_v14 = vadd.f32 %v587_v6, %v586_v61  ;;  %v3066_v18 = vpop.f32.mrb[4].mxu1 }
 0x10e   :  { %v715_v15 = vrot.slane %v714_v7, 2  ;;  %v581_v16 = vadd.f32 %v580_v8, %v579_v63  ;;  %v3068_v19 = vpop.f32.mrb[5].mxu0  ;;  %v594_v23 = vrot.slane %v593_v12, 2  ;;  %v3070_v24 = vpop.f32.mrb[5].mxu1  ;;  %v720_v28 = vrot.slane %v719_v17, 4 }
 0x10f   :  { %v575_v20 = vrot.slane %v574_v10, 1  ;;  %v702_v21 = vadd.f32 %v701_v0, %v700_v3  ;;  %v708_v22 = vrot.slane %v707_v11, 2  ;;  %v361_v25 = vpop.f32.mrb[6].mxu0  ;;  %v589_v26 = vrot.slane %v588_v14, 1  ;;  %v402_v29 = vpop.f32.mrb[6].mxu1 }
 0x110   :  { %v3072_v27 = vadd.f32 %v715_v15, %v714_v7  ;;  %v362_v30 = vpop.f32.mrb[7].mxu0  ;;  %v582_v32 = vrot.slane %v581_v16, 1  ;;  %v403_v33 = vpop.f32.mrb[7].mxu1  ;;  %v721_v35 = vadd.f32 %v720_v28, %v719_v17  ;;  %v3082_v40 = vadd.f32 %v594_v23, %v593_v12 }
 0x111   :  { %v703_v31 = vrot.slane %v702_v21, 1  ;;  %v3074_v34 = vadd.f32 %v708_v22, %v707_v11  ;;  %v3078_v37 = vadd.f32 %v575_v20, %v574_v10  ;;  %v3080_v39 = vadd.f32 %v589_v26, %v588_v14 }
 0x112   :  { %v598_v44 = vsel %vm569_vm1, %v3063_v13, 0.0  ;;  %v717_v45 = vrot.slane %v3072_v27, 1  ;;  %v722_v46 = vrot.slane %v721_v35, 2  ;;  %v686_v49 = vmul.f32 %v3063_v13, %v3063_v13 }
 0x113   :  { %v599_v47 = vrot.slane %v598_v44, 4  ;;  %v3089_v50 = vadd.f32 %v703_v31, %v702_v21  ;;  %v3091_v43 = vadd.f32 %v582_v32, %v581_v16  ;;  %v612_v51 = vsel %vm569_vm1, %v3066_v18, 0.0 }
 0x114   :  { %v688_v52 = vmul.f32 %v3066_v18, %v3066_v18  ;;  %v710_v54 = vrot.slane %v3074_v34, 1  ;;  %v726_v56 = vsel %vm569_vm1, %v686_v49, 0.0  ;;  %v613_v57 = vrot.slane %v612_v51, 4 }
 0x115   :  { %v3097_v53 = vpop.f32.mrb[8].mxu0  ;;  %v600_v55 = vadd.f32 %v599_v47, %v598_v44  ;;  %v3101_v58 = vpop.f32.mrb[8].mxu1  ;;  %v727_v60 = vrot.slane %v726_v56, 4  ;;  %v605_v62 = vsel %vm569_vm1, %v3068_v19, 0.0  ;;  %v687_v63 = vmul.f32 %v3068_v19, %v3068_v19 }
 0x116   :  { %v3103_v59 = vpop.f32.mrb[9].mxu0  ;;  %v740_v61 = vsel %vm569_vm1, %v688_v52, 0.0  ;;  %v3110_v1 = vpop.f32.mrb[9].mxu1  ;;  %v723_v3 = vadd.f32 %v722_v46, %v721_v35  ;;  %v614_v5 = vadd.f32 %v613_v57, %v612_v51  ;;  %v606_v10 = vrot.slane %v605_v62, 4 }
 0x117   :  { %v443_v2 = vpop.f32.mrb[10].mxu0  ;;  %v601_v4 = vrot.slane %v600_v55, 2  ;;  %v741_v6 = vrot.slane %v740_v61, 4  ;;  %v484_v7 = vpop.f32.mrb[10].mxu1  ;;  %v728_v9 = vadd.f32 %v727_v60, %v726_v56  ;;  %v733_v0 = vsel %vm569_vm1, %v687_v63, 0.0 }
 0x118   :  { %v444_v8 = vpop.f32.mrb[11].mxu0  ;;  %v619_v11 = vsel %vm569_vm1, %v3070_v24, 0.0  ;;  %v485_v12 = vpop.f32.mrb[11].mxu1  ;;  %v596_v14 = vrot.slane %v3082_v40, 1  ;;  %v615_v16 = vrot.slane %v614_v5, 2  ;;  %v607_v21 = vadd.f32 %v606_v10, %v605_v62 }
 0x119   :  { %v602_v15 = vadd.f32 %v601_v4, %v600_v55  ;;  %v742_v17 = vadd.f32 %v741_v6, %v740_v61  ;;  %v729_v20 = vrot.slane %v728_v9, 2  ;;  %v734_v22 = vrot.slane %v733_v0, 4 }
 0x11a   :  { %v620_v23 = vrot.slane %v619_v11, 4  ;;  %v724_v25 = vrot.slane %v723_v3, 1  ;;  %v616_v26 = vadd.f32 %v615_v16, %v614_v5  ;;  %v689_v29 = vmul.f32 %v3070_v24, %v3070_v24 }
 0x11b   :  { %v743_v28 = vrot.slane %v742_v17, 2  ;;  %v730_v30 = vadd.f32 %v729_v20, %v728_v9  ;;  %v608_v31 = vrot.slane %v607_v21, 2  ;;  %v735_v32 = vadd.f32 %v734_v22, %v733_v0 }
 0x11c   :  { %v621_v33 = vadd.f32 %v620_v23, %v619_v11  ;;  %v603_v44 = vrot.slane %v602_v15, 1  ;;  %v617_v46 = vrot.slane %v616_v26, 1  ;;  %v747_v49 = vsel %vm569_vm1, %v689_v29, 0.0 }
 0x11d   :  { %v3118_v35 = vpop.f32.mrb[12].mxu0  ;;  %v744_v47 = vadd.f32 %v743_v28, %v742_v17  ;;  %v3121_v51 = vpop.f32.mrb[12].mxu1  ;;  %v731_v55 = vrot.slane %v730_v30, 1  ;;  %v609_v56 = vadd.f32 %v608_v31, %v607_v21  ;;  %v736_v57 = vrot.slane %v735_v32, 2 }
 0x11e   :  { %v3123_v52 = vpop.f32.mrb[13].mxu0  ;;  %v622_v60 = vrot.slane %v621_v33, 2  ;;  %v3125_v61 = vpop.f32.mrb[13].mxu1  ;;  %v3128_v63 = vadd.f32 %v717_v45, %v3072_v27  ;;  %v3131_v2 = vadd.f32 %v710_v54, %v3074_v34  ;;  %v626_v5 = vsel %vm569_vm1, %v3097_v53, 0.0 }
 0x11f   :  { %v525_v62 = vpop.f32.mrb[14].mxu0  ;;  %v745_v4 = vrot.slane %v744_v47, 1  ;;  %v566_v7 = vpop.f32.mrb[14].mxu1  ;;  %v3136_v8 = vadd.f32 %v596_v14, %v3082_v40  ;;  %v3138_v9 = vadd.f32 %v724_v25, %v723_v3  ;;  %v610_v10 = vrot.slane %v609_v56, 1 }
 0x120   :  { %v526_v6 = vpop.f32.mrb[15].mxu0  ;;  %v748_v0 = vrot.slane %v747_v49, 4  ;;  %v567_v11 = vpop.f32.mrb[15].mxu1  ;;  %v3140_v12 = vadd.f32 %v603_v44, %v602_v15  ;;  %v3142_v27 = vadd.f32 %v736_v57, %v735_v32  ;;  %v627_v34 = vrot.slane %v626_v5, 4 }
 0x121   :  { %v690_v45 = vmul.f32 %v3097_v53, %v3097_v53  ;;  %v3146_v54 = vadd.f32 %v731_v55, %v730_v30  ;;  %v3148_v16 = vadd.f32 %v617_v46, %v616_v26  ;;  %v3150_v17 = vadd.f32 %v622_v60, %v621_v33 }
 0x122   :  { %v640_v40 = vsel %vm569_vm1, %v3101_v58, 0.0  ;;  %v3154_v3 = vadd.f32 %v745_v4, %v744_v47  ;;  %v628_v14 = vadd.f32 %v627_v34, %v626_v5  ;;  %v3157_v21 = vadd.f32 %v610_v10, %v609_v56 }
 0x123   :  { %v754_v15 = vsel %vm569_vm1, %v690_v45, 0.0  ;;  %v641_v20 = vrot.slane %v640_v40, 4  ;;  %v3159_v22 = vadd.f32 %v748_v0, %v747_v49  ;;  %v692_v25 = vmul.f32 %v3101_v58, %v3101_v58 }
 0x124   :  { %v755_v23 = vrot.slane %v754_v15, 4  ;;  %v629_v28 = vrot.slane %v628_v14, 2  ;;  %v633_v30 = vsel %vm569_vm1, %v3103_v59, 0.0  ;;  %v691_v44 = vmul.f32 %v3103_v59, %v3103_v59 }
 0x125   :  { %v642_v29 = vadd.f32 %v641_v20, %v640_v40  ;;  %v768_v32 = vsel %vm569_vm1, %v692_v25, 0.0  ;;  %v634_v33 = vrot.slane %v633_v30, 4  ;;  %v647_v62 = vsel %vm569_vm1, %v3110_v1, 0.0 }
 0x126   :  { %v756_v31 = vadd.f32 %v755_v23, %v754_v15  ;;  %v630_v47 = vadd.f32 %v629_v28, %v628_v14  ;;  %v769_v55 = vrot.slane %v768_v32, 4  ;;  %v761_v60 = vsel %vm569_vm1, %v691_v44, 0.0 }
 0x127   :  { %v643_v49 = vrot.slane %v642_v29, 2  ;;  %v635_v57 = vadd.f32 %v634_v33, %v633_v30  ;;  %v750_v4 = vrot.slane %v3159_v22, 2  ;;  %v762_v11 = vrot.slane %v761_v60, 4 }
 0x128   :  { %v757_v56 = vrot.slane %v756_v31, 2  ;;  %v631_v5 = vrot.slane %v630_v47, 1  ;;  %v770_v7 = vadd.f32 %v769_v55, %v768_v32  ;;  %v648_v34 = vrot.slane %v647_v62, 4 }
 0x129   :  { %v644_v6 = vadd.f32 %v643_v49, %v642_v29  ;;  %v636_v0 = vrot.slane %v635_v57, 2  ;;  %v693_v15 = vmul.f32 %v3110_v1, %v3110_v1  ;;  %v763_v25 = vadd.f32 %v762_v11, %v761_v60 }
 0x12a   :  { %v758_v10 = vadd.f32 %v757_v56, %v756_v31  ;;  %v632_v45 = vadd.f32 %v631_v5, %v630_v47  ;;  %v771_v14 = vrot.slane %v770_v7, 2  ;;  %v649_v28 = vadd.f32 %v648_v34, %v647_v62 }
 0x12b   :  { %v645_v40 = vrot.slane %v644_v6, 1  ;;  %v637_v23 = vadd.f32 %v636_v0, %v635_v57  ;;  %v775_v29 = vsel %vm569_vm1, %v693_v15, 0.0  ;;  %v764_v49 = vrot.slane %v763_v25, 2 }
 0x12c   :  { %v759_v20 = vrot.slane %v758_v10, 1  ;;  %v810_v30 = vadd.f32 %v632_v45, %v3078_v37  ;;  %v772_v44 = vadd.f32 %v771_v14, %v770_v7  ;;  %v650_v55 = vrot.slane %v649_v28, 2 }
 0x12d   :  { %v646_v33 = vadd.f32 %v645_v40, %v644_v6  ;;  %v638_v32 = vrot.slane %v637_v23, 1  ;;  %v776_v46 = vrot.slane %v775_v29, 4  ;;  %v765_v60 = vadd.f32 %v764_v49, %v763_v25 }
 0x12e   :  { %v760_v31 = vadd.f32 %v759_v20, %v758_v10  ;;  %v827_v47 = vmul.f32 0.25, %v810_v30  ;;  %v773_v56 = vrot.slane %v772_v44, 1  ;;  %v651_v62 = vadd.f32 %v650_v55, %v649_v28 }
 0x12f   :  { %v812_v5 = vadd.f32 %v646_v33, %v3080_v39  ;;  %v639_v57 = vadd.f32 %v638_v32, %v637_v23  ;;  %v766_v11 = vrot.slane %v765_v60, 1  ;;  %v777_v30 = vadd.f32 %v776_v46, %v775_v29 }
 0x130   :  { %v818_v26 = vadd.f32 %v760_v31, %v3089_v50  ;;  %v843_v0 = vmul.f32 %v827_v47, %v827_v47  ;;  %v3181_v37 = vrot.slane %v827_v47, %v3076_v36  ;;  %v774_v6 = vadd.f32 %v773_v56, %v772_v44 }
 0x131   :  { %v829_v7 = vmul.f32 0.25, %v812_v5  ;;  %v811_v34 = vadd.f32 %v639_v57, %v3091_v43  ;;  %v652_v45 = vrot.slane %v651_v62, 1  ;;  %v767_v23 = vadd.f32 %v766_v11, %v765_v60 }
 0x132   :  { %v835_v10 = vmul.f32 0.25, %v818_v26  ;;  %v915_v39 = vsub.f32 %v3036_v38, %v3181_v37  ;;  %v923_v50 = vsub.f32 %v3097_v53, %v3181_v37  ;;  %v820_v40 = vadd.f32 %v774_v6, %v3128_v63  ;;  %v2793_v38 = vld [vmem:[#allocation4 + $0x100] sm:$0xff]  }
 0x133   :  { %v845_v14 = vmul.f32 %v829_v7, %v829_v7  ;;  %v3190_v20 = vrot.slane %v829_v7, %v3076_v36  ;;  %v828_v25 = vmul.f32 0.25, %v811_v34  ;;  %v653_v28 = vadd.f32 %v652_v45, %v651_v62 }
 0x134   :  { %v851_v15 = vsub.f32 %v835_v10, %v843_v0  ;;  %v837_v26 = vmul.f32 0.25, %v820_v40  ;;  %v654_v43 = vsel %vm569_vm1, %v3118_v35, 0.0  ;;  %v819_v31 = vadd.f32 %v767_v23, %v3131_v2 }
 0x135   :  { %v917_v44 = vsub.f32 %v3042_v41, %v3190_v20  ;;  %v925_v63 = vsub.f32 %v3101_v58, %v3190_v20  ;;  %v844_v49 = vmul.f32 %v828_v25, %v828_v25  ;;  %v3200_v55 = vrot.slane %v828_v25, %v3076_v36 }
 0x136   :  { %v859_v33 = vmax.f32 %v851_v15, 0.0  ;;  %v853_v32 = vsub.f32 %v837_v26, %v845_v14  ;;  %v778_v47 = vrot.slane %v777_v30, 2  ;;  %v836_v46 = vmul.f32 0.25, %v819_v31 }
 0x137   :  { %v813_v29 = vadd.f32 %v653_v28, %v3136_v8  ;;  %v655_v5 = vrot.slane %v654_v43, 4  ;;  %v924_v60 = vsub.f32 %v3103_v59, %v3200_v55  ;;  %v694_v0 = vmul.f32 %v3118_v35, %v3118_v35  ;;  %v2797_v59 = vld [vmem:[#allocation4 + $0x108] sm:$0xff]  }
 0x138   :  { %v867_v56 = vadd.f32 1e-05, %v859_v33  ;;  %v861_v57 = vmax.f32 %v853_v32, 0.0  ;;  %v779_v62 = vadd.f32 %v778_v47, %v777_v30  ;;  %v852_v2 = vsub.f32 %v836_v46, %v844_v49 }
 0x139   :  { %v830_v6 = vmul.f32 0.25, %v813_v29  ;;  %v656_v7 = vadd.f32 %v655_v5, %v654_v43  ;;  %v782_v34 = vsel %vm569_vm1, %v694_v0, 0.0  ;;  %v668_v8 = vsel %vm569_vm1, %v3121_v51, 0.0 }
 0x13a   :  { %2887 = vrsqrt.f32 %v867_v56  ;;  %v869_v10 = vadd.f32 1e-05, %v861_v57  ;;  %v780_v11 = vrot.slane %v779_v62, 1  ;;  %v3213_v45 = vadd.f32 %v750_v4, %v3159_v22 }
 0x13b   :  { %v860_v40 = vmax.f32 %v852_v2, 0.0  ;;  %v3216_v14 = vrot.slane %v830_v6, %v3076_v36  ;;  %v657_v15 = vrot.slane %v656_v7, 2  ;;  %v783_v25 = vrot.slane %v782_v34, 4 }
 0x13c   :  { %2889 = vrsqrt.f32 %v869_v10  ;;  %v781_v23 = vadd.f32 %v780_v11, %v779_v62  ;;  %v669_v26 = vrot.slane %v668_v8, 4  ;;  %v846_v28 = vmul.f32 %v830_v6, %v830_v6 }
 0x13d   :  { %v926_v30 = vsub.f32 %v3110_v1, %v3216_v14  ;;  %v658_v43 = vadd.f32 %v657_v15, %v656_v7  ;;  %v696_v33 = vmul.f32 %v3121_v51, %v3121_v51  ;;  %v784_v4 = vadd.f32 %v783_v25, %v782_v34  ;;  %v2800_v1 = vld [vmem:[#allocation4 + $0x1d0] sm:$0xff]  }
 0x13e   :  { %v821_v22 = vadd.f32 %v781_v23, %v3138_v9  ;;  %v670_v31 = vadd.f32 %v669_v26, %v668_v8  ;;  %v661_v32 = vsel %vm569_vm1, %v3123_v52, 0.0  ;;  %v868_v49 = vadd.f32 1e-05, %v860_v40 }
 0x13f   :  { %v659_v47 = vrot.slane %v658_v43, 1  ;;  %v796_v56 = vsel %vm569_vm1, %v696_v33, 0.0  ;;  %v662_v46 = vrot.slane %v661_v32, 4  ;;  %v785_v5 = vrot.slane %v784_v4, 2 }
 0x140   :  { %v838_v29 = vmul.f32 0.25, %v821_v22  ;;  %v671_v57 = vrot.slane %v670_v31, 2  ;;  %v797_v62 = vrot.slane %v796_v56, 4  ;;  %v695_v6 = vmul.f32 %v3123_v52, %v3123_v52 }
 0x141   :  { %v660_v0 = vadd.f32 %v659_v47, %v658_v43  ;;  %v663_v2 = vadd.f32 %v662_v46, %v661_v32  ;;  %v675_v9 = vsel %vm569_vm1, %v3125_v61, 0.0  ;;  %v786_v10 = vadd.f32 %v785_v5, %v784_v4 }
 0x142   :  { %v854_v7 = vsub.f32 %v838_v29, %v846_v28  ;;  %v672_v11 = vadd.f32 %v671_v57, %v670_v31  ;;  %v798_v34 = vadd.f32 %v797_v62, %v796_v56  ;;  %2891 = vrsqrt.f32 %v868_v49 }
 0x143   :  { %v814_v40 = vadd.f32 %v660_v0, %v3140_v12  ;;  %v664_v15 = vrot.slane %v663_v2, 2  ;;  %v789_v23 = vsel %vm569_vm1, %v695_v6, 0.0  ;;  %v787_v43 = vrot.slane %v786_v10, 1 }
 0x144   :  { %v2888_v8 = vpop.eup %2887  ;;  %v862_v26 = vmax.f32 %v854_v7, 0.0  ;;  %v673_v33 = vrot.slane %v672_v11, 1  ;;  %v799_v32 = vrot.slane %v798_v34, 2  ;;  %v676_v28 = vrot.slane %v675_v9, 4 }
 0x145   :  { %v3233_v25 = vrot.slane %v2888_v8, %v3076_v36  ;;  %v831_v22 = vmul.f32 0.25, %v814_v40  ;;  %v665_v47 = vadd.f32 %v664_v15, %v663_v2  ;;  %v788_v49 = vadd.f32 %v787_v43, %v786_v10 }
 0x146   :  { %v2890_v4 = vpop.eup %2889  ;;  %v870_v12 = vadd.f32 1e-05, %v862_v26  ;;  %v674_v56 = vadd.f32 %v673_v33, %v672_v11  ;;  %v800_v5 = vadd.f32 %v799_v32, %v798_v34  ;;  %v790_v57 = vrot.slane %v789_v23, 4 }
 0x147   :  { %v3239_v31 = vmul.f32 %v3233_v25, %v923_v50  ;;  %v3242_v46 = vrot.slane %v2890_v4, %v3076_v36  ;;  %v3245_v29 = vrot.slane %v831_v22, %v3076_v36  ;;  %v822_v62 = vadd.f32 %v788_v49, %v3146_v54 }
 0x148   :  { %2893 = vrsqrt.f32 %v870_v12  ;;  %v847_v0 = vmul.f32 %v831_v22, %v831_v22  ;;  %v816_v53 = vadd.f32 %v674_v56, %v3148_v16  ;;  %v801_v7 = vrot.slane %v800_v5, 1 }
 0x149   :  { %v3253_v50 = vmul.f32 %v3242_v46, %v925_v63  ;;  %v919_v2 = vsub.f32 %v3063_v13, %v3245_v29  ;;  %v927_v6 = vsub.f32 %v3118_v35, %v3245_v29  ;;  %v3382_v10 = vrot.slane %v3142_v27, 1  ;;  %v2802_v35 = vld [vmem:[#allocation4 + $0x190] sm:$0xff]  }
 0x14a   :  { %v839_v11 = vmul.f32 0.25, %v822_v62  ;;  %v833_v34 = vmul.f32 0.25, %v816_v53  ;;  %v666_v16 = vrot.slane %v665_v47, 1  ;;  %v3383_v58 = vrot.slane %v3150_v17, 1 }
 0x14b   :  { %v739_v54 = vadd.f32 %v3382_v10, %v3142_v27  ;;  %v802_v63 = vadd.f32 %v801_v7, %v800_v5  ;;  %v791_v40 = vadd.f32 %v790_v57, %v789_v23  ;;  %v677_v15 = vadd.f32 %v676_v28, %v675_v9 }
 0x14c   :  { %v625_v8 = vadd.f32 %v3383_v58, %v3150_v17  ;;  %v752_v26 = vrot.slane %v3213_v45, 1  ;;  %v855_v43 = vsub.f32 %v839_v11, %v847_v0  ;;  %v3267_v33 = vrot.slane %v833_v34, %v3076_v36  ;;  %v2892_v32 = vpop.eup %2891 }
 0x14d   :  { %v667_v22 = vadd.f32 %v666_v16, %v665_v47  ;;  %v824_v27 = vadd.f32 %v802_v63, %v3154_v3  ;;  %v849_v4 = vmul.f32 %v833_v34, %v833_v34  ;;  %v792_v12 = vrot.slane %v791_v40, 2 }
 0x14e   :  { %v678_v49 = vrot.slane %v677_v15, 2  ;;  %v863_v56 = vmax.f32 %v855_v43, 0.0  ;;  %v921_v17 = vsub.f32 %v3066_v18, %v3267_v33  ;;  %v929_v9 = vsub.f32 %v3121_v51, %v3267_v33  ;;  %v2809_v51 = vld [vmem:[#allocation4 + $0x120] sm:$0xff]   ;;  %v2811_v33 = vld [vmem:[#allocation4 + $0x168] sm:$0xff]  }
 0x14f   :  { %v815_v23 = vadd.f32 %v667_v22, %v3157_v21  ;;  %v841_v28 = vmul.f32 0.25, %v824_v27  ;;  %v793_v5 = vadd.f32 %v792_v12, %v791_v40  ;;  %v697_v47 = vmul.f32 %v3125_v61, %v3125_v61  ;;  %v2810_v18 = vld [vmem:[#allocation4 + $0x1a0] sm:$0xff]  }
 0x150   :  { %v679_v57 = vadd.f32 %v678_v49, %v677_v15  ;;  %v871_v62 = vadd.f32 1e-05, %v863_v56  ;;  %v916_v0 = vsub.f32 %v3044_v42, %v3200_v55  ;;  %v938_v53 = vrot.slane %v2892_v32, %v3076_v36 }
 0x151   :  { %v832_v3 = vmul.f32 0.25, %v815_v23  ;;  %v857_v7 = vsub.f32 %v841_v28, %v849_v4  ;;  %v794_v10 = vrot.slane %v793_v5, 1  ;;  %v803_v34 = vsel %vm569_vm1, %v697_v47, 0.0 }
 0x152   :  { %v680_v11 = vrot.slane %v679_v57, 1  ;;  %v2894_v16 = vpop.eup %2893  ;;  %2895 = vrsqrt.f32 %v871_v62  ;;  %v804_v63 = vrot.slane %v803_v34, 4  ;;  %v964_v22 = vmul.f32 %v938_v53, %v916_v0 }
 0x153   :  { %v848_v21 = vmul.f32 %v832_v3, %v832_v3  ;;  %v3282_v58 = vrot.slane %v832_v3, %v3076_v36  ;;  %v865_v40 = vmax.f32 %v857_v7, 0.0  ;;  %v795_v15 = vadd.f32 %v794_v10, %v793_v5 }
 0x154   :  { %v681_v43 = vadd.f32 %v680_v11, %v679_v57  ;;  %v805_v32 = vadd.f32 %v804_v63, %v803_v34  ;;  %v918_v27 = vsub.f32 %v3052_v48, %v3216_v14  ;;  %v946_v4 = vrot.slane %v2894_v16, %v3076_v36  ;;  %v2796_v63 = vld [vmem:[#allocation4 + $0x1c8] sm:$0xff]  }
 0x155   :  { %v928_v42 = vsub.f32 %v3123_v52, %v3282_v58  ;;  %v873_v12 = vadd.f32 1e-05, %v865_v40  ;;  %v823_v49 = vadd.f32 %v795_v15, %v739_v54  ;;  %v980_v23 = vmax.f32 %v964_v22, 0.0 }
 0x156   :  { %v817_v56 = vadd.f32 %v681_v43, %v625_v8  ;;  %v806_v28 = vrot.slane %v805_v32, 2  ;;  %v966_v47 = vmul.f32 %v946_v4, %v918_v27  ;;  %v963_v5 = vmul.f32 %v3233_v25, %v915_v39  ;;  %v2794_v25 = vld [vmem:[#allocation4 + $0x180] sm:$0xff]  }
 0x157   :  { %v965_v57 = vmul.f32 %v3242_v46, %v917_v44  ;;  %2897 = vrsqrt.f32 %v873_v12  ;;  %v840_v48 = vmul.f32 0.25, %v823_v49  ;;  %v996_v3 = vpack.c.bf16 %v980_v23, %v980_v23  ;;  %v2795_v46 = vld [vmem:[#allocation4 + $0x148] sm:$0xff]   ;;  %v2801_v49 = vld [vmem:[#allocation4 + $0x110] sm:$0xff]  }
 0x158   :  { %v834_v62 = vmul.f32 0.25, %v817_v56  ;;  %v807_v0 = vadd.f32 %v806_v28, %v805_v32  ;;  %v982_v54 = vmax.f32 %v966_v47, 0.0  ;;  %v979_v8 = vmax.f32 %v963_v5, 0.0  ;;  %v2804_v28 = vld [vmem:[#allocation4 + $0x1d8] sm:$0xff]  }
 0x159   :  { %v981_v7 = vmax.f32 %v965_v57, 0.0  ;;  %v856_v10 = vsub.f32 %v840_v48, %v848_v21  ;;  %2067 = vmatprep.mubr.bf16.mxu0 %v996_v3  ;;  %v920_v37 = vsub.f32 %v3068_v19, %v3282_v58  ;;  %v3309_v40 = vmul.f32 %v938_v53, %v924_v60  ;;  %v2798_v53 = vld [vmem:[#allocation4 + $0x188] sm:$0xff]   ;;  %v2806_v57 = vld [vmem:[#allocation4 + $0x198] sm:$0xff]   ;;  %v2807_v48 = vld [vmem:[#allocation4 + $0x160] sm:$0xff]  }
 0x15a   :  { %v3298_v11 = vrot.slane %v834_v62, %v3076_v36  ;;  %v808_v41 = vrot.slane %v807_v0, 1  ;;  %v998_v39 = vpack.c.bf16 %v982_v54, %v982_v54  ;;  %v995_v20 = vpack.c.bf16 %v979_v8, %v979_v8  ;;  %v2813_v8 = vld [vmem:[#allocation4 + $0x128] sm:$0xff]   ;;  %v2818_v19 = vld [vmem:[#allocation4 + $0x1b0] sm:$0xff]   ;;  %v2820_v58 = vld [vmem:[#allocation4 + $0x1f8] sm:$0xff]  }
 0x15b   :  { %v997_v44 = vpack.c.bf16 %v981_v7, %v981_v7  ;;  %v864_v34 = vmax.f32 %v856_v10, 0.0  ;;  %v753_v43 = vadd.f32 %v752_v26, %v3213_v45  ;;  %v3317_v32 = vmul.f32 %v946_v4, %v926_v30  ;;  %v2799_v45 = vld [vmem:[#allocation4 + $0x150] sm:$0xff]   ;;  %v2814_v10 = vld [vmem:[#allocation4 + $0x1a8] sm:$0xff]  }
 0x15c   :  { %v930_v16 = vsub.f32 %v3125_v61, %v3298_v11  ;;  %v922_v21 = vsub.f32 %v3070_v24, %v3298_v11  ;;  %v2896_v15 = vpop.eup %2895  ;;  %v809_v22 = vadd.f32 %v808_v41, %v807_v0  ;;  %2107 = vmatprep.mubr.bf16.mxu1 %v998_v39  ;;  %2068 = vmatmul.mubr.bf16.vlgmr.msra.gmra.mrb[16].mxu0 %v995_v20  ;;  %v2816_v41 = vld [vmem:[#allocation4 + $0x1f0] sm:$0xff]   ;;  %v988_v24 = vmax.f32 %v3309_v40, 0.0  ;;  %v2829_v40 = vld [vmem:[#allocation4 + $0x208] sm:$0xff]  }
 0x15d   :  { %v950_v27 = vrot.slane %v2896_v15, %v3076_v36  ;;  %v872_v12 = vadd.f32 1e-05, %v864_v34  ;;  %2108 = vmatmul.mubr.bf16.vlgmr.msra.gmra.mrb[16].mxu1 %v997_v44  ;;  %2621 = vmatpush3.bf16.msra.mxu0 %v2793_v38  ;;  %v850_v60 = vmul.f32 %v834_v62, %v834_v62  ;;  %v2808_v62 = vld [vmem:[#allocation4 + $0x1e0] sm:$0xff]   ;;  %v2815_v38 = vld [vmem:[#allocation4 + $0x170] sm:$0xff]   ;;  %v2822_v34 = vld [vmem:[#allocation4 + $0x1b8] sm:$0xff]   ;;  %v990_v61 = vmax.f32 %v3317_v32, 0.0 }
 0x15e   :  { %v825_v55 = vadd.f32 %v809_v22, %v753_v43  ;;  %2643 = vmatpush3.bf16.msra.mxu1 %v2794_v25  ;;  %2622 = vmatprep.subr.bf16.mxu0 %v2795_v46  ;;  %v2817_v20 = vld [vmem:[#allocation4 + $0x130] sm:$0xff]   ;;  %v2821_v25 = vld [vmem:[#allocation4 + $0x138] sm:$0xff]   ;;  %v2823_v15 = vld [vmem:[#allocation4 + $0x240] sm:$0xff]  }
 0x15f   :  { %v3323_v26 = vmul.f32 %v950_v27, %v927_v6  ;;  %2899 = vrsqrt.f32 %v872_v12  ;;  %2644 = vmatprep.subr.bf16.mxu1 %v2796_v63  ;;  %v3328_v14 = vmul.f32 %v950_v27, %v919_v2  ;;  %v2803_v6 = vld [vmem:[#allocation4 + $0x158] sm:$0xff]   ;;  %v2824_v27 = vld [vmem:[#allocation4 + $0x2c0] sm:$0xff]   ;;  %v2832_v32 = vld [vmem:[#allocation4 + $0x2d0] sm:$0xff]  }
 0x160   :  { %v842_v30 = vmul.f32 0.25, %v825_v55  ;;  %v2805_v2 = vld [vmem:[#allocation4 + $0x118] sm:$0xff]   ;;  %v2825_v12 = vld [vmem:[#allocation4 + $0x200] sm:$0xff]   ;;  %v2827_v55 = vld [vmem:[#allocation4 + $0x248] sm:$0xff]  }
 0x161   :  { %v2898_v4 = vpop.eup %2897  ;;  %2623 = vmatpush3.bf16.msra.mxu0 %v2797_v59  ;;  %v983_v63 = vmax.f32 %v3328_v14, 0.0  ;;  %v2831_v14 = vld [vmem:[#allocation4 + $0x250] sm:$0xff]  }
 0x162   :  { %v958_v56 = vrot.slane %v2898_v4, %v3076_v36  ;;  %v858_v23 = vsub.f32 %v842_v30, %v850_v60  ;;  %2645 = vmatpush3.bf16.msra.mxu1 %v2798_v53  ;;  %2624 = vmatprep.subr.bf16.mxu0 %v2799_v45  ;;  %v1004_v60 = vpack.c.bf16 %v988_v24, %v988_v24  ;;  %v2828_v53 = vld [vmem:[#allocation4 + $0x2c8] sm:$0xff]   ;;  %v2833_v30 = vld [vmem:[#allocation4 + $0x210] sm:$0xff]   ;;  %v2871_v24 = vld [vmem:[#allocation4 + $0x360] sm:$0xff]  }
 0x163   :  { %2646 = vmatprep.subr.bf16.mxu1 %v2800_v1  ;;  %v999_v11 = vpack.c.bf16 %v983_v63, %v983_v63  ;;  %v1006_v45 = vpack.c.bf16 %v990_v61, %v990_v61  ;;  %v2830_v1 = vld [vmem:[#allocation4 + $0x288] sm:$0xff]   ;;  %v2834_v4 = vld [vmem:[#allocation4 + $0x290] sm:$0xff]   ;;  %v2874_v61 = vld [vmem:[#allocation4 + $0x3a0] sm:$0xff]  }
 0x164   :  { %v3334_v47 = vmul.f32 %v958_v56, %v929_v9  ;;  %v866_v13 = vmax.f32 %v858_v23, 0.0  ;;  %v3339_v29 = vmul.f32 %v958_v56, %v921_v17  ;;  %v2812_v17 = vld [vmem:[#allocation4 + $0x1e8] sm:$0xff]   ;;  %v2836_v56 = vld [vmem:[#allocation4 + $0x2d8] sm:$0xff]   ;;  %v2866_v63 = vld [vmem:[#allocation4 + $0x390] sm:$0xff]  }
 0x165   :  { %2625 = vmatpush3.bf16.msra.mxu0 %v2801_v49  ;;  %v2835_v49 = vld [vmem:[#allocation4 + $0x258] sm:$0xff]  }
 0x166   :  { %v874_v5 = vadd.f32 1e-05, %v866_v13  ;;  %2647 = vmatpush3.bf16.msra.mxu1 %v2802_v35  ;;  %2626 = vmatprep.subr.bf16.mxu0 %v2803_v6  ;;  %v985_v22 = vmax.f32 %v3339_v29, 0.0  ;;  %v2837_v23 = vld [vmem:[#allocation4 + $0x218] sm:$0xff]   ;;  %v2839_v6 = vld [vmem:[#allocation4 + $0x260] sm:$0xff]  }
 0x167   :  { %2648 = vmatprep.subr.bf16.mxu1 %v2804_v28  ;;  %v2838_v35 = vld [vmem:[#allocation4 + $0x298] sm:$0xff]   ;;  %v2840_v28 = vld [vmem:[#allocation4 + $0x2e0] sm:$0xff]  }
 0x168   :  { %2901 = vrsqrt.f32 %v874_v5  ;;  %v1001_v59 = vpack.c.bf16 %v985_v22, %v985_v22  ;;  %v2841_v13 = vld [vmem:[#allocation4 + $0x220] sm:$0xff]   ;;  %v2844_v5 = vld [vmem:[#allocation4 + $0x2e8] sm:$0xff]   ;;  %v2869_v22 = vld [vmem:[#allocation4 + $0x318] sm:$0xff]  }
 0x169   :  { %v2900_v3 = vpop.eup %2899  ;;  %2627 = vmatpush3.bf16.msra.mxu0 %v2805_v2  ;;  %v2842_v29 = vld [vmem:[#allocation4 + $0x2a0] sm:$0xff]   ;;  %v2843_v2 = vld [vmem:[#allocation4 + $0x268] sm:$0xff]  }
 0x16a   :  { %v954_v9 = vrot.slane %v2900_v3, %v3076_v36  ;;  %2649 = vmatpush3.bf16.msra.mxu1 %v2806_v57  ;;  %2628 = vmatprep.subr.bf16.mxu0 %v2807_v48  ;;  %v2845_v57 = vld [vmem:[#allocation4 + $0x228] sm:$0xff]   ;;  %v2848_v3 = vld [vmem:[#allocation4 + $0x2f0] sm:$0xff]  }
 0x16b   :  { %2650 = vmatprep.subr.bf16.mxu1 %v2808_v62  ;;  %v2846_v48 = vld [vmem:[#allocation4 + $0x2a8] sm:$0xff]   ;;  %v2847_v62 = vld [vmem:[#allocation4 + $0x270] sm:$0xff]  }
 0x16c   :  { %v968_v0 = vmul.f32 %v954_v9, %v920_v37  ;;  %v3348_v54 = vmul.f32 %v954_v9, %v928_v42  ;;  %v2819_v37 = vld [vmem:[#allocation4 + $0x178] sm:$0xff]   ;;  %v2850_v9 = vld [vmem:[#allocation4 + $0x2b0] sm:$0xff]  }
 0x16d   :  { %2629 = vmatpush3.bf16.msra.mxu0 %v2809_v51  ;;  %v2849_v51 = vld [vmem:[#allocation4 + $0x230] sm:$0xff]  }
 0x16e   :  { %v984_v7 = vmax.f32 %v968_v0, 0.0  ;;  %2651 = vmatpush3.bf16.msra.mxu1 %v2810_v18  ;;  %2630 = vmatprep.subr.bf16.mxu0 %v2811_v33  ;;  %v2851_v18 = vld [vmem:[#allocation4 + $0x278] sm:$0xff]   ;;  %v987_v0 = vmax.f32 %v3239_v31, 0.0  ;;  %v2859_v31 = vld [vmem:[#allocation4 + $0x348] sm:$0xff]  }
 0x16f   :  { %2652 = vmatprep.subr.bf16.mxu1 %v2812_v17  ;;  %v2852_v33 = vld [vmem:[#allocation4 + $0x2f8] sm:$0xff]  }
 0x170   :  { %v1000_v39 = vpack.c.bf16 %v984_v7, %v984_v7  ;;  %v2853_v17 = vld [vmem:[#allocation4 + $0x238] sm:$0xff]   ;;  %v2855_v7 = vld [vmem:[#allocation4 + $0x340] sm:$0xff]  }
 0x171   :  { %2631 = vmatpush3.bf16.msra.mxu0 %v2813_v8  ;;  %v2854_v8 = vld [vmem:[#allocation4 + $0x2b8] sm:$0xff]  }
 0x172   :  { %v2902_v44 = vpop.eup %2901  ;;  %2147 = vmatprep.mubr.bf16.mxu0 %v1000_v39  ;;  %2653 = vmatpush3.bf16.msra.mxu1 %v2814_v10  ;;  %v989_v10 = vmax.f32 %v3253_v50, 0.0  ;;  %v2857_v39 = vld [vmem:[#allocation4 + $0x300] sm:$0xff]  }
 0x173   :  { %v962_v52 = vrot.slane %v2902_v44, %v3076_v36  ;;  %2632 = vmatprep.subr.bf16.mxu0 %v2815_v38  ;;  %2654 = vmatprep.subr.bf16.mxu1 %v2816_v41  ;;  %v2856_v38 = vld [vmem:[#allocation4 + $0x3c0] sm:$0xff]   ;;  %v992_v41 = vmax.f32 %v3348_v54, 0.0  ;;  %v1003_v44 = vpack.c.bf16 %v987_v0, %v987_v0  ;;  %v2862_v54 = vld [vmem:[#allocation4 + $0x388] sm:$0xff]  }
 0x175   :  { %v970_v42 = vmul.f32 %v962_v52, %v922_v21  ;;  %2633 = vmatpush3.bf16.msra.mxu0 %v2817_v20  ;;  %v3357_v46 = vmul.f32 %v962_v52, %v930_v16  ;;  %v2826_v16 = vld [vmem:[#allocation4 + $0x280] sm:$0xff]   ;;  %v1008_v52 = vpack.c.bf16 %v992_v41, %v992_v41 }
 0x176   :  { %2655 = vmatpush3.bf16.msra.mxu1 %v2818_v19  ;;  %2634 = vmatprep.subr.bf16.mxu0 %v2819_v37  ;;  %v2858_v19 = vld [vmem:[#allocation4 + $0x380] sm:$0xff]   ;;  %v1005_v37 = vpack.c.bf16 %v989_v10, %v989_v10 }
 0x177   :  { %v986_v43 = vmax.f32 %v970_v42, 0.0  ;;  %2656 = vmatprep.subr.bf16.mxu1 %v2820_v58  ;;  %v994_v20 = vmax.f32 %v3357_v46, 0.0  ;;  %v2860_v58 = vld [vmem:[#allocation4 + $0x3c8] sm:$0xff]   ;;  %v2864_v46 = vld [vmem:[#allocation4 + $0x3d0] sm:$0xff]  }
 0x178   :  { %v2861_v42 = vld [vmem:[#allocation4 + $0x308] sm:$0xff]  }
 0x179   :  { %v1002_v21 = vpack.c.bf16 %v986_v43, %v986_v43  ;;  %2635 = vmatpush3.bf16.msra.mxu0 %v2821_v25  ;;  %v1010_v50 = vpack.c.bf16 %v994_v20, %v994_v20  ;;  %v2863_v25 = vld [vmem:[#allocation4 + $0x350] sm:$0xff]   ;;  %v2868_v43 = vld [vmem:[#allocation4 + $0x3d8] sm:$0xff]  }
 0x17a   :  { %2657 = vmatpush3.bf16.msra.mxu1 %v2822_v34  ;;  %2664 = vmatprep.subr.bf16.mxu0 %v2823_v15  ;;  %v2865_v34 = vld [vmem:[#allocation4 + $0x310] sm:$0xff]   ;;  %v2867_v15 = vld [vmem:[#allocation4 + $0x358] sm:$0xff]  }
 0x17b   :  { %2187 = vmatprep.mubr.bf16.mxu1 %v1002_v21  ;;  %2686 = vmatprep.subr.bf16.mxu1 %v2824_v27  ;;  %v2870_v27 = vld [vmem:[#allocation4 + $0x398] sm:$0xff]   ;;  %v2872_v21 = vld [vmem:[#allocation4 + $0x3e0] sm:$0xff]  }
 0x17c   :  { %2148 = vmatmul.mubr.bf16.vlgmr.msra.gmra.mrb[20].mxu0 %v999_v11  ;;  %v2875_v11 = vld [vmem:[#allocation4 + $0x368] sm:$0xff]  }
 0x17d   :  { %2188 = vmatmul.mubr.bf16.vlgmr.msra.gmra.mrb[20].mxu1 %v1001_v59  ;;  %2665 = vmatpush3.bf16.msra.mxu0 %v2825_v12  ;;  %v2873_v12 = vld [vmem:[#allocation4 + $0x320] sm:$0xff]   ;;  %v2877_v59 = vld [vmem:[#allocation4 + $0x328] sm:$0xff]  }
 0x17e   :  { %2227 = vmatprep.mubr.bf16.mxu0 %v1004_v60  ;;  %2687 = vmatpush3.bf16.msra.mxu1 %v2826_v16  ;;  %v2876_v16 = vld [vmem:[#allocation4 + $0x3e8] sm:$0xff]   ;;  %v2879_v60 = vld [vmem:[#allocation4 + $0x370] sm:$0xff]  }
 0x17f   :  { %2267 = vmatprep.mubr.bf16.mxu1 %v1006_v45  ;;  %2666 = vmatprep.subr.bf16.mxu0 %v2827_v55  ;;  %v2878_v55 = vld [vmem:[#allocation4 + $0x3a8] sm:$0xff]   ;;  %v2881_v45 = vld [vmem:[#allocation4 + $0x330] sm:$0xff]  }
 0x180   :  { %2688 = vmatprep.subr.bf16.mxu1 %v2828_v53  ;;  %v2880_v53 = vld [vmem:[#allocation4 + $0x3f0] sm:$0xff]  }
 0x181   :  { %2667 = vmatpush3.bf16.msra.mxu0 %v2829_v40  ;;  %v2882_v40 = vld [vmem:[#allocation4 + $0x3b0] sm:$0xff]  }
 0x182   :  { %2689 = vmatpush3.bf16.msra.mxu1 %v2830_v1  ;;  %2668 = vmatprep.subr.bf16.mxu0 %v2831_v14  ;;  %v2883_v1 = vld [vmem:[#allocation4 + $0x378] sm:$0xff]  }
 0x183   :  { %2690 = vmatprep.subr.bf16.mxu1 %v2832_v32  ;;  %v2884_v14 = vld [vmem:[#allocation4 + $0x3f8] sm:$0xff]  }
 0x184   :  { %v2885_v32 = vld [vmem:[#allocation4 + $0x338] sm:$0xff]  }
 0x185   :  { %2669 = vmatpush3.bf16.msra.mxu0 %v2833_v30  ;;  %v991_v30 = vmax.f32 %v3323_v26, 0.0 }
 0x186   :  { %2691 = vmatpush3.bf16.msra.mxu1 %v2834_v4  ;;  %2670 = vmatprep.subr.bf16.mxu0 %v2835_v49  ;;  %v2886_v4 = vld [vmem:[#allocation4 + $0x3b8] sm:$0xff]   ;;  %v993_v49 = vmax.f32 %v3334_v47, 0.0 }
 0x187   :  { %2692 = vmatprep.subr.bf16.mxu1 %v2836_v56  ;;  %v1007_v56 = vpack.c.bf16 %v991_v30, %v991_v30 }
 0x189   :  { %2671 = vmatpush3.bf16.msra.mxu0 %v2837_v23  ;;  %v1009_v23 = vpack.c.bf16 %v993_v49, %v993_v49 }
 0x18a   :  { %2693 = vmatpush3.bf16.msra.mxu1 %v2838_v35  ;;  %2672 = vmatprep.subr.bf16.mxu0 %v2839_v6 }
 0x18b   :  { %2694 = vmatprep.subr.bf16.mxu1 %v2840_v28 }
 0x18d   :  { %2673 = vmatpush3.bf16.msra.mxu0 %v2841_v13 }
 0x18e   :  { %2695 = vmatpush3.bf16.msra.mxu1 %v2842_v29  ;;  %2674 = vmatprep.subr.bf16.mxu0 %v2843_v2 }
 0x18f   :  { %2696 = vmatprep.subr.bf16.mxu1 %v2844_v5 }
 0x191   :  { %2675 = vmatpush3.bf16.msra.mxu0 %v2845_v57 }
 0x192   :  { %2697 = vmatpush3.bf16.msra.mxu1 %v2846_v48  ;;  %2676 = vmatprep.subr.bf16.mxu0 %v2847_v62 }
 0x193   :  { %2698 = vmatprep.subr.bf16.mxu1 %v2848_v3 }
 0x195   :  { %2677 = vmatpush3.bf16.msra.mxu0 %v2849_v51 }
 0x196   :  { %2699 = vmatpush3.bf16.msra.mxu1 %v2850_v9  ;;  %2678 = vmatprep.subr.bf16.mxu0 %v2851_v18 }
 0x197   :  { %2700 = vmatprep.subr.bf16.mxu1 %v2852_v33 }
 0x199   :  { %2679 = vmatpush3.bf16.msra.mxu0 %v2853_v17 }
 0x19a   :  { %2701 = vmatpush3.bf16.msra.mxu1 %v2854_v8  ;;  %2708 = vmatprep.subr.bf16.mxu0 %v2855_v7 }
 0x19b   :  { %2730 = vmatprep.subr.bf16.mxu1 %v2856_v38 }
 0x19c   :  { %2228 = vmatmul.mubr.bf16.vlgmr.msra.gmra.mrb[24].mxu0 %v1003_v44 }
 0x19d   :  { %2268 = vmatmul.mubr.bf16.vlgmr.msra.gmra.mrb[24].mxu1 %v1005_v37  ;;  %2709 = vmatpush3.bf16.msra.mxu0 %v2857_v39 }
 0x19e   :  { %2307 = vmatprep.mubr.bf16.mxu0 %v1008_v52  ;;  %2731 = vmatpush3.bf16.msra.mxu1 %v2858_v19 }
 0x19f   :  { %2347 = vmatprep.mubr.bf16.mxu1 %v1010_v50  ;;  %2710 = vmatprep.subr.bf16.mxu0 %v2859_v31 }
 0x1a0   :  { %2732 = vmatprep.subr.bf16.mxu1 %v2860_v58 }
 0x1a1   :  { %2711 = vmatpush3.bf16.msra.mxu0 %v2861_v42 }
 0x1a2   :  { %2733 = vmatpush3.bf16.msra.mxu1 %v2862_v54  ;;  %2712 = vmatprep.subr.bf16.mxu0 %v2863_v25 }
 0x1a3   :  { %2734 = vmatprep.subr.bf16.mxu1 %v2864_v46 }
 0x1a5   :  { %2713 = vmatpush3.bf16.msra.mxu0 %v2865_v34 }
 0x1a6   :  { %2735 = vmatpush3.bf16.msra.mxu1 %v2866_v63  ;;  %2714 = vmatprep.subr.bf16.mxu0 %v2867_v15 }
 0x1a7   :  { %2736 = vmatprep.subr.bf16.mxu1 %v2868_v43 }
 0x1a9   :  { %2715 = vmatpush3.bf16.msra.mxu0 %v2869_v22 }
 0x1aa   :  { %2737 = vmatpush3.bf16.msra.mxu1 %v2870_v27  ;;  %2716 = vmatprep.subr.bf16.mxu0 %v2871_v24 }
 0x1ab   :  { %2738 = vmatprep.subr.bf16.mxu1 %v2872_v21 }
 0x1ad   :  { %2717 = vmatpush3.bf16.msra.mxu0 %v2873_v12 }
 0x1ae   :  { %2739 = vmatpush3.bf16.msra.mxu1 %v2874_v61  ;;  %2718 = vmatprep.subr.bf16.mxu0 %v2875_v11 }
 0x1af   :  { %2740 = vmatprep.subr.bf16.mxu1 %v2876_v16 }
 0x1b1   :  { %2719 = vmatpush3.bf16.msra.mxu0 %v2877_v59 }
 0x1b2   :  { %2741 = vmatpush3.bf16.msra.mxu1 %v2878_v55  ;;  %2720 = vmatprep.subr.bf16.mxu0 %v2879_v60 }
 0x1b3   :  { %2742 = vmatprep.subr.bf16.mxu1 %v2880_v53 }
 0x1b5   :  { %2721 = vmatpush3.bf16.msra.mxu0 %v2881_v45 }
 0x1b6   :  { %2743 = vmatpush3.bf16.msra.mxu1 %v2882_v40  ;;  %2722 = vmatprep.subr.bf16.mxu0 %v2883_v1 }
 0x1b7   :  { %2744 = vmatprep.subr.bf16.mxu1 %v2884_v14 }
 0x1b9   :  { %2723 = vmatpush3.bf16.msra.mxu0 %v2885_v32 }
 0x1ba   :  { %2745 = vmatpush3.bf16.msra.mxu1 %v2886_v4 }
 0x1bc   :  { %2308 = vmatmul.mubr.bf16.vlgmr.msra.gmra.mrb[28].mxu0 %v1007_v56 }
 0x1bd   :  { %2348 = vmatmul.mubr.bf16.vlgmr.msra.gmra.mrb[28].mxu1 %v1009_v23 }
 0x22f   :  { %v2592_v35 = vpop.f32.mrb[16].mxu0 }
 0x230   :  { %v2614_v6 = vpop.f32.mrb[16].mxu1  ;;  %v2593_v28 = vpop.f32.mrb[17].mxu0 }
 0x231   :  { %v2594_v13 = vadd.f32 %v2593_v28, %v2592_v35  ;;  %v2615_v29 = vpop.f32.mrb[17].mxu1  ;;  %v2595_v2 = vpop.f32.mrb[18].mxu0 }
 0x232   :  { %v2616_v5 = vadd.f32 %v2615_v29, %v2614_v6  ;;  %v2617_v26 = vpop.f32.mrb[18].mxu1  ;;  %v2596_v57 = vpop.f32.mrb[19].mxu0 }
 0x233   :  { %v2618_v48 = vpop.f32.mrb[19].mxu1 }
 0x234   :  { %v2110_v62 = vadd.f32 %v2616_v5, %v2594_v13 }
 0x24f   :  { %v2636_v3 = vpop.f32.mrb[20].mxu0 }
 0x250   :  { %v2658_v47 = vpop.f32.mrb[20].mxu1  ;;  %v2637_v51 = vpop.f32.mrb[21].mxu0 }
 0x251   :  { %v2638_v9 = vadd.f32 %v2637_v51, %v2636_v3  ;;  %v2659_v18 = vpop.f32.mrb[21].mxu1  ;;  %v2639_v33 = vpop.f32.mrb[22].mxu0 }
 0x252   :  { %v2660_v17 = vadd.f32 %v2659_v18, %v2658_v47  ;;  %v2661_v0 = vpop.f32.mrb[22].mxu1  ;;  %v2640_v8 = vpop.f32.mrb[23].mxu0 }
 0x253   :  { %v2150_v7 = vadd.f32 %v2638_v9, %v2110_v62  ;;  %v2662_v10 = vpop.f32.mrb[23].mxu1 }
 0x255   :  { %v2190_v38 = vadd.f32 %v2660_v17, %v2150_v7 }
 0x26f   :  { %v2680_v41 = vpop.f32.mrb[24].mxu0 }
 0x270   :  { %v2702_v39 = vpop.f32.mrb[24].mxu1  ;;  %v2681_v20 = vpop.f32.mrb[25].mxu0 }
 0x271   :  { %v2682_v44 = vadd.f32 %v2681_v20, %v2680_v41  ;;  %v2703_v19 = vpop.f32.mrb[25].mxu1  ;;  %v2683_v37 = vpop.f32.mrb[26].mxu0 }
 0x272   :  { %v2704_v31 = vadd.f32 %v2703_v19, %v2702_v39  ;;  %v2705_v52 = vpop.f32.mrb[26].mxu1  ;;  %v2684_v58 = vpop.f32.mrb[27].mxu0 }
 0x273   :  { %v2230_v50 = vadd.f32 %v2682_v44, %v2190_v38  ;;  %v2706_v42 = vpop.f32.mrb[27].mxu1 }
 0x275   :  { %v2270_v54 = vadd.f32 %v2704_v31, %v2230_v50 }
 0x28f   :  { %v2724_v25 = vpop.f32.mrb[28].mxu0 }
 0x290   :  { %v2746_v46 = vpop.f32.mrb[28].mxu1  ;;  %v2725_v34 = vpop.f32.mrb[29].mxu0 }
 0x291   :  { %v2726_v63 = vadd.f32 %v2725_v34, %v2724_v25  ;;  %v2747_v15 = vpop.f32.mrb[29].mxu1  ;;  %v2727_v43 = vpop.f32.mrb[30].mxu0 }
 0x292   :  { %v2748_v22 = vadd.f32 %v2747_v15, %v2746_v46  ;;  %v2749_v27 = vpop.f32.mrb[30].mxu1  ;;  %v2728_v24 = vpop.f32.mrb[31].mxu0 }
 0x293   :  { %v2310_v21 = vadd.f32 %v2726_v63, %v2270_v54  ;;  %v2750_v12 = vpop.f32.mrb[31].mxu1 }
 0x295   :  { %v2350_v61 = vadd.f32 %v2748_v22, %v2310_v21 }
 0x297   :  { %v2362_v11 = vmul.f32 %v2350_v61, %v2350_v61  ;;  %v2355_v16 = vsel %vm569_vm1, %v2350_v61, 0.0 }
 0x298   :  { %v2356_v59 = vrot.slane %v2355_v16, 4 }
 0x299   :  { %v2363_v55 = vsel %vm569_vm1, %v2362_v11, 0.0 }
 0x29a   :  { %v2357_v60 = vadd.f32 %v2356_v59, %v2355_v16  ;;  %v2364_v53 = vrot.slane %v2363_v55, 4 }
 0x29c   :  { %v2358_v45 = vrot.slane %v2357_v60, 2  ;;  %v2365_v40 = vadd.f32 %v2364_v53, %v2363_v55 }
 0x29e   :  { %v2359_v1 = vadd.f32 %v2358_v45, %v2357_v60  ;;  %v2366_v14 = vrot.slane %v2365_v40, 2 }
 0x2a0   :  { %v2360_v32 = vrot.slane %v2359_v1, 1  ;;  %v2367_v30 = vadd.f32 %v2366_v14, %v2365_v40 }
 0x2a2   :  { %v2361_v4 = vadd.f32 %v2360_v32, %v2359_v1  ;;  %v2368_v49 = vrot.slane %v2367_v30, 1 }
 0x2a4   :  { %2370 = vrot.lane.b32.xlu0 %v2361_v4, %s2955_s23  ;;  %v2369_v56 = vadd.f32 %v2368_v49, %v2367_v30 }
 0x2a8   :  { %2376 = vrot.lane.b32.xlu0 %v2369_v56, %s2955_s23 }
 0x316   :  { %v2371_v23 = vpop.permute.xlu0 %2370 }
 0x317   :  { %v2372_v35 = vadd.f32 %v2371_v23, %v2361_v4 }
 0x319   :  { %2373 = vrot.lane.b32.xlu1 %v2372_v35, %s2959_s0 }
 0x31a   :  { %v2377_v6 = vpop.permute.xlu0 %2376 }
 0x31b   :  { %v2378_v28 = vadd.f32 %v2377_v6, %v2369_v56 }
 0x31d   :  { %2379 = vrot.lane.b32.xlu1 %v2378_v28, %s2959_s0 }
 0x38b   :  { %v2374_v13 = vpop.permute.xlu1 %2373 }
 0x38c   :  { %v2375_v29 = vadd.f32 %v2374_v13, %v2372_v35 }
 0x38e   :  { %v2383_v2 = vmul.f32 0.125, %v2375_v29 }
 0x38f   :  { %v2380_v5 = vpop.permute.xlu1 %2379 }
 0x390   :  { %v2381_v26 = vadd.f32 %v2380_v5, %v2378_v28  ;;  %v2385_v57 = vmul.f32 %v2383_v2, %v2383_v2  ;;  %v2393_v51 = vrot.slane %v2383_v2, %v3076_v36 }
 0x392   :  { %v2384_v48 = vmul.f32 0.125, %v2381_v26  ;;  %v2394_v18 = vsub.f32 %v2350_v61, %v2393_v51 }
 0x394   :  { %v2386_v62 = vsub.f32 %v2384_v48, %v2385_v57 }
 0x396   :  { %v2387_v3 = vmax.f32 %v2386_v62, 0.0 }
 0x398   :  { %v2388_v47 = vadd.f32 1e-05, %v2387_v3 }
 0x39a   :  { %2903 = vrsqrt.f32 %v2388_v47 }
 0x3a4   :  { %v2904_v9 = vpop.eup %2903 }
 0x3a5   :  { %v2398_v33 = vrot.slane %v2904_v9, %v3076_v36 }
 0x3a7   :  { %v2399_v17 = vmul.f32 %v2398_v33, %v2394_v18 }
 0x3a9   :  { %v2400_v0 = vmax.f32 %v2399_v17, 0.0 }
 0x3ab   :  { %2401 = vst [vmem:[%s3381_s3] sm:$0x3] %v2400_v0 }
 0x3ac   :  { %2406 = vsyncpa [#allocation3], 1 }
 0x3ad   :  { %2407 = vsyncpa [#allocation5], 1 }

</bundles_post_ra>
